<compile_context>
chip_gen: v7x
topology: tpu7x:2x2x1
jax: 0.10.0
libtpu: 0.0.40
codegen_flags: <defaults>
</compile_context>

<pallas_src>
import functools

import jax
import jax.numpy as jnp
from jax.experimental import pallas as pl
from jax.experimental.pallas import tpu as pltpu


# ------------------------------ Pallas kernel -------------------------------

def bilstm_content_agg_kernel(ids_ref,      # (B_pad,)  int32, SMEM (scalar prefetch)
                              feat_hbm,     # (N, D)    f32, HBM (pl.ANY) - feature_list[1]
                              gat_w_ref,    # (D, D)    compute dtype
                              gat_b_ref,    # (1, D)    f32
                              wih_ref,      # (D, 8H)   [W_ih_fwd | W_ih_bwd], compute dtype
                              whh_ref,      # (2H, 8H)  blockdiag(W_hh_fwd, W_hh_bwd)
                              b_ref,        # (1, 8H)   [b_fwd | b_bwd] (b_ih + b_hh), f32
                              o_ref,        # (TB, D)   output tile, f32
                              xbuf,         # (TB, D)   f32 VMEM scratch (gathered rows)
                              sems):        # (TB,)     DMA semaphores
    TB, D = xbuf.shape
    H4 = b_ref.shape[1] // 2        # 4 * hidden
    H = H4 // 4                     # hidden = D // 2
    cdt = gat_w_ref.dtype           # MXU operand dtype (f32 or bf16)

    # ---- gather feature_list[1][id_batch] rows for this batch tile (DMA gather) ----
    base = pl.program_id(0) * TB
    copies = []
    for r in range(TB):             # static unroll; TB is a small compile-time constant
        idx = ids_ref[base + r]
        cp = pltpu.make_async_copy(feat_hbm.at[pl.ds(idx, 1)],
                                   xbuf.at[pl.ds(r, 1)],
                                   sems.at[r])
        cp.start()
        copies.append(cp)
    for cp in copies:
        cp.wait()

    x0 = xbuf[...].astype(cdt)                                        # (TB, D) img embeds

    # ---- GAT stand-in: img_text_embed = tanh(x0 @ W_gat + b_gat) ----
    # TODO(synk): the real GATEncoder (text/object graph attention over img_text_process
    # outputs, vocab lookup, box features) is an external module with host-side
    # preprocessing; substituted with a deterministic projection.
    proj = (jnp.dot(x0, gat_w_ref[...], preferred_element_type=jnp.float32)
            + gat_b_ref[...])
    x1 = jnp.tanh(proj).astype(cdt)                                   # (TB, D)

    # ---- fused input projection: both timesteps x both directions, one MXU op ----
    xcat = jnp.concatenate([x0, x1], axis=0)                          # (2*TB, D)
    gx = (jnp.dot(xcat, wih_ref[...], preferred_element_type=jnp.float32)
          + b_ref[...])                                               # (2*TB, 8H) f32
    # rows [0:TB] -> t=0 inputs, rows [TB:2TB] -> t=1 inputs
    # cols [0:4H] -> forward direction, cols [4H:8H] -> backward direction

    def gate_act(gates):
        # Two full-vreg EUP passes, then lane slices (PyTorch gate order i, f, g, o).
        sg = jax.nn.sigmoid(gates)
        th = jnp.tanh(gates)
        return (sg[:, 0:H], sg[:, H:2 * H], th[:, 2 * H:3 * H], sg[:, 3 * H:4 * H])

    # t=0 step of each direction: h == c == 0, so the recurrent matmul is skipped.
    i_, f_, g_, o_ = gate_act(gx[0:TB, 0:H4])              # forward dir, t = 0
    cf0 = i_ * g_
    hf0 = o_ * jnp.tanh(cf0)

    i_, f_, g_, o_ = gate_act(gx[TB:2 * TB, H4:2 * H4])    # backward dir, t = 1
    cb1 = i_ * g_
    hb1 = o_ * jnp.tanh(cb1)

    # Single block-diagonal recurrent matmul covering both directions at once.
    hcat = jnp.concatenate([hf0.astype(cdt), hb1.astype(cdt)], axis=1)      # (TB, 2H)
    rec = jnp.dot(hcat, whh_ref[...], preferred_element_type=jnp.float32)   # (TB, 8H)

    i_, f_, g_, o_ = gate_act(gx[TB:2 * TB, 0:H4] + rec[:, 0:H4])           # forward, t = 1
    cf1 = f_ * cf0 + i_ * g_
    hf1 = o_ * jnp.tanh(cf1)

    i_, f_, g_, o_ = gate_act(gx[0:TB, H4:2 * H4] + rec[:, H4:2 * H4])      # backward, t = 0
    cb0 = f_ * cb1 + i_ * g_
    hb0 = o_ * jnp.tanh(cb0)

    # all_state mean over time (2 steps): concat(0.5*(hf0+hf1), 0.5*(hb0+hb1))
    o_ref[...] = jnp.concatenate([0.5 * (hf0 + hf1), 0.5 * (hb0 + hb1)],
                                 axis=-1).astype(o_ref.dtype)


# ------------------------------- wrapper -------------------------------------

def hhgsi_imge_forward(id_batch, feature_table, gat_w, gat_b,
                       wih_f, whh_f, b_f, wih_b, whh_b, b_b,
                       *, tile_b=128, compute_dtype=jnp.bfloat16):
    """Fused gather + GAT stand-in + BiLSTM + mean-over-time. Returns (B, D) f32."""
    N, D = feature_table.shape
    H = D // 2
    B = int(id_batch.shape[0])
    num_tiles = pl.cdiv(B, tile_b)
    B_pad = num_tiles * tile_b

    ids = jnp.zeros((B_pad,), jnp.int32).at[:B].set(id_batch.astype(jnp.int32))

    cdt = compute_dtype
    gat_w_c = gat_w.astype(cdt)
    gat_b_c = jnp.reshape(gat_b, (1, D)).astype(jnp.float32)
    # [W_ih_fwd | W_ih_bwd] : one wide MXU operand for all four input projections.
    wih_cat = jnp.concatenate([wih_f, wih_b], axis=1).astype(cdt)            # (D, 8H)
    # blockdiag(W_hh_fwd, W_hh_bwd) : one recurrent matmul for both directions.
    whh_bd = jnp.zeros((2 * H, 8 * H), jnp.float32)
    whh_bd = whh_bd.at[:H, :4 * H].set(whh_f)
    whh_bd = whh_bd.at[H:, 4 * H:].set(whh_b)
    whh_bd = whh_bd.astype(cdt)                                              # (2H, 8H)
    b_cat = jnp.concatenate([jnp.reshape(b_f, (1, 4 * H)),
                             jnp.reshape(b_b, (1, 4 * H))], axis=1).astype(jnp.float32)

    # Advisory cost hint so XLA can schedule neighbors around this small custom call.
    per_tile_flops = (2 * tile_b * D * D                      # GAT stand-in
                      + 2 * (2 * tile_b) * D * (8 * H)        # fused input projection
                      + 2 * tile_b * (2 * H) * (8 * H))       # block-diag recurrent
    per_tile_trans = tile_b * D + 8 * tile_b * 4 * H + 4 * tile_b * H
    w_bytes = ((gat_w_c.size + wih_cat.size + whh_bd.size) * jnp.dtype(cdt).itemsize
               + (gat_b_c.size + b_cat.size) * 4)
    bytes_accessed = int(2 * B_pad * D * 4 + 4 * B_pad + w_bytes)
    cost = pl.CostEstimate(flops=int(num_tiles * per_tile_flops),
                           transcendentals=int(num_tiles * per_tile_trans),
                           bytes_accessed=bytes_accessed)

    grid_spec = pltpu.PrefetchScalarGridSpec(
        num_scalar_prefetch=1,                     # id_batch -> SMEM
        grid=(num_tiles,),                         # batch tiles
        in_specs=[
            pl.BlockSpec(memory_space=pl.ANY),                     # feature table stays in HBM
            pl.BlockSpec((D, D), lambda i, ids: (0, 0)),           # gat_w   (VMEM resident)
            pl.BlockSpec((1, D), lambda i, ids: (0, 0)),           # gat_b
            pl.BlockSpec((D, 8 * H), lambda i, ids: (0, 0)),       # [W_ih_f | W_ih_b]
            pl.BlockSpec((2 * H, 8 * H), lambda i, ids: (0, 0)),   # blockdiag(W_hh_f, W_hh_b)
            pl.BlockSpec((1, 8 * H), lambda i, ids: (0, 0)),       # [b_f | b_b]
        ],
        out_specs=pl.BlockSpec((tile_b, D), lambda i, ids: (i, 0)),
        scratch_shapes=[
            pltpu.VMEM((tile_b, D), jnp.float32),                  # gathered rows
            pltpu.SemaphoreType.DMA((tile_b,)),                    # one sem per row DMA
        ],
    )

    out = pl.pallas_call(
        bilstm_content_agg_kernel,
        out_shape=jax.ShapeDtypeStruct((B_pad, D), jnp.float32),
        grid_spec=grid_spec,
        compiler_params=pltpu.CompilerParams(
            dimension_semantics=("parallel",),          # shard batch tiles across TCs (v7x)
            vmem_limit_bytes=32 * 1024 * 1024,          # explicit headroom (v7x: 64 MiB phys)
        ),
        cost_estimate=cost,
    )(ids, feature_table, gat_w_c, gat_b_c, wih_cat, whh_bd, b_cat)

    return out[:B]


# --------------------------- pure-JAX reference ------------------------------

def reference_forward(id_batch, feature_table, gat_w, gat_b,
                      wih_f, whh_f, b_f, wih_b, whh_b, b_b):
    D = feature_table.shape[1]
    H = D // 2
    x0 = feature_table[id_batch]
    x1 = jnp.tanh(x0 @ gat_w + gat_b)

    def step(x_t, h, c, wih, whh, b):
        g = x_t @ wih + h @ whh + b
        i = jax.nn.sigmoid(g[:, :H]); f = jax.nn.sigmoid(g[:, H:2 * H])
        gg = jnp.tanh(g[:, 2 * H:3 * H]); o = jax.nn.sigmoid(g[:, 3 * H:])
        c = f * c + i * gg
        return o * jnp.tanh(c), c

    B = x0.shape[0]
    z = jnp.zeros((B, H), jnp.float32)
    hf0, cf0 = step(x0, z, z, wih_f, whh_f, b_f)
    hf1, _ = step(x1, hf0, cf0, wih_f, whh_f, b_f)
    hb1, cb1 = step(x1, z, z, wih_b, whh_b, b_b)
    hb0, _ = step(x0, hb1, cb1, wih_b, whh_b, b_b)
    return jnp.concatenate([0.5 * (hf0 + hf1), 0.5 * (hb0 + hb1)], axis=-1)


# ----------------------------------- main ------------------------------------

if __name__ == "__main__":
    key = jax.random.PRNGKey(0)
    B = 16           # mini-batch of node ids
    D = 64           # embed_d
    H = D // 2       # bidirectional LSTM hidden = embed_d / 2
    N_NODES = 40     # size of feature_list[1]
    TB = 8           # batch tile (use 128-512 in production)

    ks = jax.random.split(key, 10)
    scale = 1.0 / (H ** 0.5)

    # "feature_list[1]" : image-node embedding table
    feature_table = jax.random.normal(ks[0], (N_NODES, D), jnp.float32)

    # GATEncoder stand-in params (deterministic)
    gat_w = 0.1 * jax.random.normal(ks[1], (D, D), jnp.float32)
    gat_b = jnp.full((D,), 0.1, jnp.float32)

    # i_content_rnn = nn.LSTM(embed_d, embed_d/2, 1, bidirectional=True)
    # Stored pre-transposed for right-multiplication: (in, 4H), (H, 4H); biases pre-summed.
    wih_f = scale * jax.random.normal(ks[2], (D, 4 * H), jnp.float32)
    whh_f = scale * jax.random.normal(ks[3], (H, 4 * H), jnp.float32)
    b_f = (scale * jax.random.normal(ks[4], (1, 4 * H), jnp.float32)
           + scale * jax.random.normal(ks[5], (1, 4 * H), jnp.float32))
    wih_b = scale * jax.random.normal(ks[6], (D, 4 * H), jnp.float32)
    whh_b = scale * jax.random.normal(ks[7], (H, 4 * H), jnp.float32)
    b_b = (scale * jax.random.normal(ks[8], (1, 4 * H), jnp.float32)
           + scale * jax.random.normal(ks[9], (1, 4 * H), jnp.float32))

    # forward(triple_list_batch, 0): c_id_batch = [x[0] for x in triple_list_batch]
    triple_list_batch = [(int(i) % N_NODES, 0, 0) for i in range(B)]
    c_id_batch = jnp.asarray([t[0] for t in triple_list_batch], jnp.int32)

    ref = reference_forward(c_id_batch, feature_table, gat_w, gat_b,
                            wih_f, whh_f, b_f, wih_b, whh_b, b_b)

    # f32 compute path (v5e-style; also validates the kernel math).
    out_f32 = hhgsi_imge_forward(c_id_batch, feature_table, gat_w, gat_b,
                                 wih_f, whh_f, b_f, wih_b, whh_b, b_b,
                                 tile_b=TB, compute_dtype=jnp.float32)
    out_f32 = jax.block_until_ready(out_f32)
    assert out_f32.shape == (B, D)
    assert jnp.allclose(out_f32, ref, rtol=2e-2, atol=2e-2)

    # bf16 MXU-operand path (recommended on v6e/v7x); state/activations stay f32.
    out_bf16 = hhgsi_imge_forward(c_id_batch, feature_table, gat_w, gat_b,
                                  wih_f, whh_f, b_f, wih_b, whh_b, b_b,
                                  tile_b=TB, compute_dtype=jnp.bfloat16)
    out_bf16 = jax.block_until_ready(out_bf16)
    assert out_bf16.shape == (B, D)
    assert jnp.allclose(out_bf16, ref, rtol=6e-2, atol=6e-2)

    print("KERNEL_OK")
</pallas_src>

<mosaic_0001>
module attributes {stable_mosaic.version = 11 : i64} {
  func.func @bilstm_content_agg_kernel(%arg0: i32, %arg1: memref<16xi32, #tpu.memory_space<smem>>, %arg2: memref<40x64xf32, #tpu.memory_space<any>>, %arg3: memref<64x64xf32, #tpu.memory_space<vmem>>, %arg4: memref<1x64xf32, #tpu.memory_space<vmem>>, %arg5: memref<64x256xf32, #tpu.memory_space<vmem>>, %arg6: memref<64x256xf32, #tpu.memory_space<vmem>>, %arg7: memref<1x256xf32, #tpu.memory_space<vmem>>, %arg8: memref<8x64xf32, #tpu.memory_space<vmem>>, %arg9: memref<8x64xf32, #tpu.memory_space<vmem>>, %arg10: memref<8x!tpu.dma_semaphore, #tpu.memory_space<semaphore_mem>>) attributes {dimension_semantics = [#tpu.dimension_semantics<parallel>], iteration_bounds = array<i64: 2>, scalar_prefetch = 1 : i64, scratch_operands = 2 : i64, tpu.core_type = #tpu.core_type<tc>, window_params = [{}, {pipeline_mode = #tpu.pipeline_mode<synchronous>, transform_indices = @transform_1, window_bounds = array<i64: 64, 64>}, {pipeline_mode = #tpu.pipeline_mode<synchronous>, transform_indices = @transform_2, window_bounds = array<i64: 1, 64>}, {pipeline_mode = #tpu.pipeline_mode<synchronous>, transform_indices = @transform_3, window_bounds = array<i64: 64, 256>}, {pipeline_mode = #tpu.pipeline_mode<synchronous>, transform_indices = @transform_4, window_bounds = array<i64: 64, 256>}, {pipeline_mode = #tpu.pipeline_mode<synchronous>, transform_indices = @transform_5, window_bounds = array<i64: 1, 256>}, {transform_indices = @transform_6, window_bounds = array<i64: 8, 64>}]} {
    %c8_i32 = arith.constant 8 : i32
    %0 = arith.muli %arg0, %c8_i32 : i32
    %c0_i32 = arith.constant 0 : i32
    %1 = arith.addi %0, %c0_i32 : i32
    %2 = arith.index_cast %1 : i32 to index
    %3 = memref.load %arg1[%2] : memref<16xi32, #tpu.memory_space<smem>>
    %c0_i32_0 = arith.constant 0 : i32
    %c0_i32_1 = arith.constant 0 : i32
    %4 = tpu.memref_slice %arg2[%3, %c0_i32_1] : memref<40x64xf32, #tpu.memory_space<any>> -> memref<1x64xf32, #tpu.memory_space<any>>
    %c0_i32_2 = arith.constant 0 : i32
    %c0_i32_3 = arith.constant 0 : i32
    %5 = tpu.memref_slice %arg9[%c0_i32_2, %c0_i32_3] : memref<8x64xf32, #tpu.memory_space<vmem>> -> memref<1x64xf32, #tpu.memory_space<vmem>>
    %6 = tpu.memref_slice %arg10[%c0_i32_0] : memref<8x!tpu.dma_semaphore, #tpu.memory_space<semaphore_mem>> -> memref<1x!tpu.dma_semaphore, #tpu.memory_space<semaphore_mem>>
    %7 = tpu.memref_squeeze %6 : memref<1x!tpu.dma_semaphore, #tpu.memory_space<semaphore_mem>> -> memref<!tpu.dma_semaphore, #tpu.memory_space<semaphore_mem>>
    tpu.enqueue_dma source(%4 : memref<1x64xf32, #tpu.memory_space<any>>) target(%5 : memref<1x64xf32, #tpu.memory_space<vmem>>) target_semaphore(%7 : memref<!tpu.dma_semaphore, #tpu.memory_space<semaphore_mem>>)
    %c1_i32 = arith.constant 1 : i32
    %8 = arith.addi %0, %c1_i32 : i32
    %9 = arith.index_cast %8 : i32 to index
    %10 = memref.load %arg1[%9] : memref<16xi32, #tpu.memory_space<smem>>
    %c1_i32_4 = arith.constant 1 : i32
    %c0_i32_5 = arith.constant 0 : i32
    %11 = tpu.memref_slice %arg2[%10, %c0_i32_5] : memref<40x64xf32, #tpu.memory_space<any>> -> memref<1x64xf32, #tpu.memory_space<any>>
    %c1_i32_6 = arith.constant 1 : i32
    %c0_i32_7 = arith.constant 0 : i32
    %12 = tpu.memref_slice %arg9[%c1_i32_6, %c0_i32_7] : memref<8x64xf32, #tpu.memory_space<vmem>> -> memref<1x64xf32, #tpu.memory_space<vmem>>
    %13 = tpu.memref_slice %arg10[%c1_i32_4] : memref<8x!tpu.dma_semaphore, #tpu.memory_space<semaphore_mem>> -> memref<1x!tpu.dma_semaphore, #tpu.memory_space<semaphore_mem>>
    %14 = tpu.memref_squeeze %13 : memref<1x!tpu.dma_semaphore, #tpu.memory_space<semaphore_mem>> -> memref<!tpu.dma_semaphore, #tpu.memory_space<semaphore_mem>>
    tpu.enqueue_dma source(%11 : memref<1x64xf32, #tpu.memory_space<any>>) target(%12 : memref<1x64xf32, #tpu.memory_space<vmem>>) target_semaphore(%14 : memref<!tpu.dma_semaphore, #tpu.memory_space<semaphore_mem>>)
    %c2_i32 = arith.constant 2 : i32
    %15 = arith.addi %0, %c2_i32 : i32
    %16 = arith.index_cast %15 : i32 to index
    %17 = memref.load %arg1[%16] : memref<16xi32, #tpu.memory_space<smem>>
    %c2_i32_8 = arith.constant 2 : i32
    %c0_i32_9 = arith.constant 0 : i32
    %18 = tpu.memref_slice %arg2[%17, %c0_i32_9] : memref<40x64xf32, #tpu.memory_space<any>> -> memref<1x64xf32, #tpu.memory_space<any>>
    %c2_i32_10 = arith.constant 2 : i32
    %c0_i32_11 = arith.constant 0 : i32
    %19 = tpu.memref_slice %arg9[%c2_i32_10, %c0_i32_11] : memref<8x64xf32, #tpu.memory_space<vmem>> -> memref<1x64xf32, #tpu.memory_space<vmem>>
    %20 = tpu.memref_slice %arg10[%c2_i32_8] : memref<8x!tpu.dma_semaphore, #tpu.memory_space<semaphore_mem>> -> memref<1x!tpu.dma_semaphore, #tpu.memory_space<semaphore_mem>>
    %21 = tpu.memref_squeeze %20 : memref<1x!tpu.dma_semaphore, #tpu.memory_space<semaphore_mem>> -> memref<!tpu.dma_semaphore, #tpu.memory_space<semaphore_mem>>
    tpu.enqueue_dma source(%18 : memref<1x64xf32, #tpu.memory_space<any>>) target(%19 : memref<1x64xf32, #tpu.memory_space<vmem>>) target_semaphore(%21 : memref<!tpu.dma_semaphore, #tpu.memory_space<semaphore_mem>>)
    %c3_i32 = arith.constant 3 : i32
    %22 = arith.addi %0, %c3_i32 : i32
    %23 = arith.index_cast %22 : i32 to index
    %24 = memref.load %arg1[%23] : memref<16xi32, #tpu.memory_space<smem>>
    %c3_i32_12 = arith.constant 3 : i32
    %c0_i32_13 = arith.constant 0 : i32
    %25 = tpu.memref_slice %arg2[%24, %c0_i32_13] : memref<40x64xf32, #tpu.memory_space<any>> -> memref<1x64xf32, #tpu.memory_space<any>>
    %c3_i32_14 = arith.constant 3 : i32
    %c0_i32_15 = arith.constant 0 : i32
    %26 = tpu.memref_slice %arg9[%c3_i32_14, %c0_i32_15] : memref<8x64xf32, #tpu.memory_space<vmem>> -> memref<1x64xf32, #tpu.memory_space<vmem>>
    %27 = tpu.memref_slice %arg10[%c3_i32_12] : memref<8x!tpu.dma_semaphore, #tpu.memory_space<semaphore_mem>> -> memref<1x!tpu.dma_semaphore, #tpu.memory_space<semaphore_mem>>
    %28 = tpu.memref_squeeze %27 : memref<1x!tpu.dma_semaphore, #tpu.memory_space<semaphore_mem>> -> memref<!tpu.dma_semaphore, #tpu.memory_space<semaphore_mem>>
    tpu.enqueue_dma source(%25 : memref<1x64xf32, #tpu.memory_space<any>>) target(%26 : memref<1x64xf32, #tpu.memory_space<vmem>>) target_semaphore(%28 : memref<!tpu.dma_semaphore, #tpu.memory_space<semaphore_mem>>)
    %c4_i32 = arith.constant 4 : i32
    %29 = arith.addi %0, %c4_i32 : i32
    %30 = arith.index_cast %29 : i32 to index
    %31 = memref.load %arg1[%30] : memref<16xi32, #tpu.memory_space<smem>>
    %c4_i32_16 = arith.constant 4 : i32
    %c0_i32_17 = arith.constant 0 : i32
    %32 = tpu.memref_slice %arg2[%31, %c0_i32_17] : memref<40x64xf32, #tpu.memory_space<any>> -> memref<1x64xf32, #tpu.memory_space<any>>
    %c4_i32_18 = arith.constant 4 : i32
    %c0_i32_19 = arith.constant 0 : i32
    %33 = tpu.memref_slice %arg9[%c4_i32_18, %c0_i32_19] : memref<8x64xf32, #tpu.memory_space<vmem>> -> memref<1x64xf32, #tpu.memory_space<vmem>>
    %34 = tpu.memref_slice %arg10[%c4_i32_16] : memref<8x!tpu.dma_semaphore, #tpu.memory_space<semaphore_mem>> -> memref<1x!tpu.dma_semaphore, #tpu.memory_space<semaphore_mem>>
    %35 = tpu.memref_squeeze %34 : memref<1x!tpu.dma_semaphore, #tpu.memory_space<semaphore_mem>> -> memref<!tpu.dma_semaphore, #tpu.memory_space<semaphore_mem>>
    tpu.enqueue_dma source(%32 : memref<1x64xf32, #tpu.memory_space<any>>) target(%33 : memref<1x64xf32, #tpu.memory_space<vmem>>) target_semaphore(%35 : memref<!tpu.dma_semaphore, #tpu.memory_space<semaphore_mem>>)
    %c5_i32 = arith.constant 5 : i32
    %36 = arith.addi %0, %c5_i32 : i32
    %37 = arith.index_cast %36 : i32 to index
    %38 = memref.load %arg1[%37] : memref<16xi32, #tpu.memory_space<smem>>
    %c5_i32_20 = arith.constant 5 : i32
    %c0_i32_21 = arith.constant 0 : i32
    %39 = tpu.memref_slice %arg2[%38, %c0_i32_21] : memref<40x64xf32, #tpu.memory_space<any>> -> memref<1x64xf32, #tpu.memory_space<any>>
    %c5_i32_22 = arith.constant 5 : i32
    %c0_i32_23 = arith.constant 0 : i32
    %40 = tpu.memref_slice %arg9[%c5_i32_22, %c0_i32_23] : memref<8x64xf32, #tpu.memory_space<vmem>> -> memref<1x64xf32, #tpu.memory_space<vmem>>
    %41 = tpu.memref_slice %arg10[%c5_i32_20] : memref<8x!tpu.dma_semaphore, #tpu.memory_space<semaphore_mem>> -> memref<1x!tpu.dma_semaphore, #tpu.memory_space<semaphore_mem>>
    %42 = tpu.memref_squeeze %41 : memref<1x!tpu.dma_semaphore, #tpu.memory_space<semaphore_mem>> -> memref<!tpu.dma_semaphore, #tpu.memory_space<semaphore_mem>>
    tpu.enqueue_dma source(%39 : memref<1x64xf32, #tpu.memory_space<any>>) target(%40 : memref<1x64xf32, #tpu.memory_space<vmem>>) target_semaphore(%42 : memref<!tpu.dma_semaphore, #tpu.memory_space<semaphore_mem>>)
    %c6_i32 = arith.constant 6 : i32
    %43 = arith.addi %0, %c6_i32 : i32
    %44 = arith.index_cast %43 : i32 to index
    %45 = memref.load %arg1[%44] : memref<16xi32, #tpu.memory_space<smem>>
    %c6_i32_24 = arith.constant 6 : i32
    %c0_i32_25 = arith.constant 0 : i32
    %46 = tpu.memref_slice %arg2[%45, %c0_i32_25] : memref<40x64xf32, #tpu.memory_space<any>> -> memref<1x64xf32, #tpu.memory_space<any>>
    %c6_i32_26 = arith.constant 6 : i32
    %c0_i32_27 = arith.constant 0 : i32
    %47 = tpu.memref_slice %arg9[%c6_i32_26, %c0_i32_27] : memref<8x64xf32, #tpu.memory_space<vmem>> -> memref<1x64xf32, #tpu.memory_space<vmem>>
    %48 = tpu.memref_slice %arg10[%c6_i32_24] : memref<8x!tpu.dma_semaphore, #tpu.memory_space<semaphore_mem>> -> memref<1x!tpu.dma_semaphore, #tpu.memory_space<semaphore_mem>>
    %49 = tpu.memref_squeeze %48 : memref<1x!tpu.dma_semaphore, #tpu.memory_space<semaphore_mem>> -> memref<!tpu.dma_semaphore, #tpu.memory_space<semaphore_mem>>
    tpu.enqueue_dma source(%46 : memref<1x64xf32, #tpu.memory_space<any>>) target(%47 : memref<1x64xf32, #tpu.memory_space<vmem>>) target_semaphore(%49 : memref<!tpu.dma_semaphore, #tpu.memory_space<semaphore_mem>>)
    %c7_i32 = arith.constant 7 : i32
    %50 = arith.addi %0, %c7_i32 : i32
    %51 = arith.index_cast %50 : i32 to index
    %52 = memref.load %arg1[%51] : memref<16xi32, #tpu.memory_space<smem>>
    %c7_i32_28 = arith.constant 7 : i32
    %c0_i32_29 = arith.constant 0 : i32
    %53 = tpu.memref_slice %arg2[%52, %c0_i32_29] : memref<40x64xf32, #tpu.memory_space<any>> -> memref<1x64xf32, #tpu.memory_space<any>>
    %c7_i32_30 = arith.constant 7 : i32
    %c0_i32_31 = arith.constant 0 : i32
    %54 = tpu.memref_slice %arg9[%c7_i32_30, %c0_i32_31] : memref<8x64xf32, #tpu.memory_space<vmem>> -> memref<1x64xf32, #tpu.memory_space<vmem>>
    %55 = tpu.memref_slice %arg10[%c7_i32_28] : memref<8x!tpu.dma_semaphore, #tpu.memory_space<semaphore_mem>> -> memref<1x!tpu.dma_semaphore, #tpu.memory_space<semaphore_mem>>
    %56 = tpu.memref_squeeze %55 : memref<1x!tpu.dma_semaphore, #tpu.memory_space<semaphore_mem>> -> memref<!tpu.dma_semaphore, #tpu.memory_space<semaphore_mem>>
    tpu.enqueue_dma source(%53 : memref<1x64xf32, #tpu.memory_space<any>>) target(%54 : memref<1x64xf32, #tpu.memory_space<vmem>>) target_semaphore(%56 : memref<!tpu.dma_semaphore, #tpu.memory_space<semaphore_mem>>)
    %c0_i32_32 = arith.constant 0 : i32
    %c0_i32_33 = arith.constant 0 : i32
    %57 = tpu.memref_slice %arg2[%3, %c0_i32_33] : memref<40x64xf32, #tpu.memory_space<any>> -> memref<1x64xf32, #tpu.memory_space<any>>
    %c0_i32_34 = arith.constant 0 : i32
    %c0_i32_35 = arith.constant 0 : i32
    %58 = tpu.memref_slice %arg9[%c0_i32_34, %c0_i32_35] : memref<8x64xf32, #tpu.memory_space<vmem>> -> memref<1x64xf32, #tpu.memory_space<vmem>>
    %59 = tpu.memref_slice %arg10[%c0_i32_32] : memref<8x!tpu.dma_semaphore, #tpu.memory_space<semaphore_mem>> -> memref<1x!tpu.dma_semaphore, #tpu.memory_space<semaphore_mem>>
    %60 = tpu.memref_squeeze %59 : memref<1x!tpu.dma_semaphore, #tpu.memory_space<semaphore_mem>> -> memref<!tpu.dma_semaphore, #tpu.memory_space<semaphore_mem>>
    tpu.wait_dma2 semaphore(%60 : memref<!tpu.dma_semaphore, #tpu.memory_space<semaphore_mem>>) src(%57 : memref<1x64xf32, #tpu.memory_space<any>>) dst(%58 : memref<1x64xf32, #tpu.memory_space<vmem>>)
    %c1_i32_36 = arith.constant 1 : i32
    %c0_i32_37 = arith.constant 0 : i32
    %61 = tpu.memref_slice %arg2[%10, %c0_i32_37] : memref<40x64xf32, #tpu.memory_space<any>> -> memref<1x64xf32, #tpu.memory_space<any>>
    %c1_i32_38 = arith.constant 1 : i32
    %c0_i32_39 = arith.constant 0 : i32
    %62 = tpu.memref_slice %arg9[%c1_i32_38, %c0_i32_39] : memref<8x64xf32, #tpu.memory_space<vmem>> -> memref<1x64xf32, #tpu.memory_space<vmem>>
    %63 = tpu.memref_slice %arg10[%c1_i32_36] : memref<8x!tpu.dma_semaphore, #tpu.memory_space<semaphore_mem>> -> memref<1x!tpu.dma_semaphore, #tpu.memory_space<semaphore_mem>>
    %64 = tpu.memref_squeeze %63 : memref<1x!tpu.dma_semaphore, #tpu.memory_space<semaphore_mem>> -> memref<!tpu.dma_semaphore, #tpu.memory_space<semaphore_mem>>
    tpu.wait_dma2 semaphore(%64 : memref<!tpu.dma_semaphore, #tpu.memory_space<semaphore_mem>>) src(%61 : memref<1x64xf32, #tpu.memory_space<any>>) dst(%62 : memref<1x64xf32, #tpu.memory_space<vmem>>)
    %c2_i32_40 = arith.constant 2 : i32
    %c0_i32_41 = arith.constant 0 : i32
    %65 = tpu.memref_slice %arg2[%17, %c0_i32_41] : memref<40x64xf32, #tpu.memory_space<any>> -> memref<1x64xf32, #tpu.memory_space<any>>
    %c2_i32_42 = arith.constant 2 : i32
    %c0_i32_43 = arith.constant 0 : i32
    %66 = tpu.memref_slice %arg9[%c2_i32_42, %c0_i32_43] : memref<8x64xf32, #tpu.memory_space<vmem>> -> memref<1x64xf32, #tpu.memory_space<vmem>>
    %67 = tpu.memref_slice %arg10[%c2_i32_40] : memref<8x!tpu.dma_semaphore, #tpu.memory_space<semaphore_mem>> -> memref<1x!tpu.dma_semaphore, #tpu.memory_space<semaphore_mem>>
    %68 = tpu.memref_squeeze %67 : memref<1x!tpu.dma_semaphore, #tpu.memory_space<semaphore_mem>> -> memref<!tpu.dma_semaphore, #tpu.memory_space<semaphore_mem>>
    tpu.wait_dma2 semaphore(%68 : memref<!tpu.dma_semaphore, #tpu.memory_space<semaphore_mem>>) src(%65 : memref<1x64xf32, #tpu.memory_space<any>>) dst(%66 : memref<1x64xf32, #tpu.memory_space<vmem>>)
    %c3_i32_44 = arith.constant 3 : i32
    %c0_i32_45 = arith.constant 0 : i32
    %69 = tpu.memref_slice %arg2[%24, %c0_i32_45] : memref<40x64xf32, #tpu.memory_space<any>> -> memref<1x64xf32, #tpu.memory_space<any>>
    %c3_i32_46 = arith.constant 3 : i32
    %c0_i32_47 = arith.constant 0 : i32
    %70 = tpu.memref_slice %arg9[%c3_i32_46, %c0_i32_47] : memref<8x64xf32, #tpu.memory_space<vmem>> -> memref<1x64xf32, #tpu.memory_space<vmem>>
    %71 = tpu.memref_slice %arg10[%c3_i32_44] : memref<8x!tpu.dma_semaphore, #tpu.memory_space<semaphore_mem>> -> memref<1x!tpu.dma_semaphore, #tpu.memory_space<semaphore_mem>>
    %72 = tpu.memref_squeeze %71 : memref<1x!tpu.dma_semaphore, #tpu.memory_space<semaphore_mem>> -> memref<!tpu.dma_semaphore, #tpu.memory_space<semaphore_mem>>
    tpu.wait_dma2 semaphore(%72 : memref<!tpu.dma_semaphore, #tpu.memory_space<semaphore_mem>>) src(%69 : memref<1x64xf32, #tpu.memory_space<any>>) dst(%70 : memref<1x64xf32, #tpu.memory_space<vmem>>)
    %c4_i32_48 = arith.constant 4 : i32
    %c0_i32_49 = arith.constant 0 : i32
    %73 = tpu.memref_slice %arg2[%31, %c0_i32_49] : memref<40x64xf32, #tpu.memory_space<any>> -> memref<1x64xf32, #tpu.memory_space<any>>
    %c4_i32_50 = arith.constant 4 : i32
    %c0_i32_51 = arith.constant 0 : i32
    %74 = tpu.memref_slice %arg9[%c4_i32_50, %c0_i32_51] : memref<8x64xf32, #tpu.memory_space<vmem>> -> memref<1x64xf32, #tpu.memory_space<vmem>>
    %75 = tpu.memref_slice %arg10[%c4_i32_48] : memref<8x!tpu.dma_semaphore, #tpu.memory_space<semaphore_mem>> -> memref<1x!tpu.dma_semaphore, #tpu.memory_space<semaphore_mem>>
    %76 = tpu.memref_squeeze %75 : memref<1x!tpu.dma_semaphore, #tpu.memory_space<semaphore_mem>> -> memref<!tpu.dma_semaphore, #tpu.memory_space<semaphore_mem>>
    tpu.wait_dma2 semaphore(%76 : memref<!tpu.dma_semaphore, #tpu.memory_space<semaphore_mem>>) src(%73 : memref<1x64xf32, #tpu.memory_space<any>>) dst(%74 : memref<1x64xf32, #tpu.memory_space<vmem>>)
    %c5_i32_52 = arith.constant 5 : i32
    %c0_i32_53 = arith.constant 0 : i32
    %77 = tpu.memref_slice %arg2[%38, %c0_i32_53] : memref<40x64xf32, #tpu.memory_space<any>> -> memref<1x64xf32, #tpu.memory_space<any>>
    %c5_i32_54 = arith.constant 5 : i32
    %c0_i32_55 = arith.constant 0 : i32
    %78 = tpu.memref_slice %arg9[%c5_i32_54, %c0_i32_55] : memref<8x64xf32, #tpu.memory_space<vmem>> -> memref<1x64xf32, #tpu.memory_space<vmem>>
    %79 = tpu.memref_slice %arg10[%c5_i32_52] : memref<8x!tpu.dma_semaphore, #tpu.memory_space<semaphore_mem>> -> memref<1x!tpu.dma_semaphore, #tpu.memory_space<semaphore_mem>>
    %80 = tpu.memref_squeeze %79 : memref<1x!tpu.dma_semaphore, #tpu.memory_space<semaphore_mem>> -> memref<!tpu.dma_semaphore, #tpu.memory_space<semaphore_mem>>
    tpu.wait_dma2 semaphore(%80 : memref<!tpu.dma_semaphore, #tpu.memory_space<semaphore_mem>>) src(%77 : memref<1x64xf32, #tpu.memory_space<any>>) dst(%78 : memref<1x64xf32, #tpu.memory_space<vmem>>)
    %c6_i32_56 = arith.constant 6 : i32
    %c0_i32_57 = arith.constant 0 : i32
    %81 = tpu.memref_slice %arg2[%45, %c0_i32_57] : memref<40x64xf32, #tpu.memory_space<any>> -> memref<1x64xf32, #tpu.memory_space<any>>
    %c6_i32_58 = arith.constant 6 : i32
    %c0_i32_59 = arith.constant 0 : i32
    %82 = tpu.memref_slice %arg9[%c6_i32_58, %c0_i32_59] : memref<8x64xf32, #tpu.memory_space<vmem>> -> memref<1x64xf32, #tpu.memory_space<vmem>>
    %83 = tpu.memref_slice %arg10[%c6_i32_56] : memref<8x!tpu.dma_semaphore, #tpu.memory_space<semaphore_mem>> -> memref<1x!tpu.dma_semaphore, #tpu.memory_space<semaphore_mem>>
    %84 = tpu.memref_squeeze %83 : memref<1x!tpu.dma_semaphore, #tpu.memory_space<semaphore_mem>> -> memref<!tpu.dma_semaphore, #tpu.memory_space<semaphore_mem>>
    tpu.wait_dma2 semaphore(%84 : memref<!tpu.dma_semaphore, #tpu.memory_space<semaphore_mem>>) src(%81 : memref<1x64xf32, #tpu.memory_space<any>>) dst(%82 : memref<1x64xf32, #tpu.memory_space<vmem>>)
    %c7_i32_60 = arith.constant 7 : i32
    %c0_i32_61 = arith.constant 0 : i32
    %85 = tpu.memref_slice %arg2[%52, %c0_i32_61] : memref<40x64xf32, #tpu.memory_space<any>> -> memref<1x64xf32, #tpu.memory_space<any>>
    %c7_i32_62 = arith.constant 7 : i32
    %c0_i32_63 = arith.constant 0 : i32
    %86 = tpu.memref_slice %arg9[%c7_i32_62, %c0_i32_63] : memref<8x64xf32, #tpu.memory_space<vmem>> -> memref<1x64xf32, #tpu.memory_space<vmem>>
    %87 = tpu.memref_slice %arg10[%c7_i32_60] : memref<8x!tpu.dma_semaphore, #tpu.memory_space<semaphore_mem>> -> memref<1x!tpu.dma_semaphore, #tpu.memory_space<semaphore_mem>>
    %88 = tpu.memref_squeeze %87 : memref<1x!tpu.dma_semaphore, #tpu.memory_space<semaphore_mem>> -> memref<!tpu.dma_semaphore, #tpu.memory_space<semaphore_mem>>
    tpu.wait_dma2 semaphore(%88 : memref<!tpu.dma_semaphore, #tpu.memory_space<semaphore_mem>>) src(%85 : memref<1x64xf32, #tpu.memory_space<any>>) dst(%86 : memref<1x64xf32, #tpu.memory_space<vmem>>)
    %c0 = arith.constant 0 : index
    %c0_64 = arith.constant 0 : index
    %89 = vector.load %arg9[%c0, %c0_64] : memref<8x64xf32, #tpu.memory_space<vmem>>, vector<8x64xf32>
    %c0_65 = arith.constant 0 : index
    %c0_66 = arith.constant 0 : index
    %90 = vector.load %arg3[%c0_65, %c0_66] : memref<64x64xf32, #tpu.memory_space<vmem>>, vector<64x64xf32>
    %cst = arith.constant dense<0.000000e+00> : vector<8x64xf32>
    %91 = tpu.matmul %89, %90, %cst {dimension_numbers = #tpu.dot_dimension_numbers<[1], [0], [0], [1], [0, 0, 1, 1], [], []>} : vector<8x64xf32>, vector<64x64xf32>, vector<8x64xf32> -> vector<8x64xf32>
    %c0_67 = arith.constant 0 : index
    %c0_68 = arith.constant 0 : index
    %92 = vector.load %arg4[%c0_67, %c0_68] : memref<1x64xf32, #tpu.memory_space<vmem>>, vector<1x64xf32>
    %93 = vector.broadcast %92 : vector<1x64xf32> to vector<8x64xf32>
    %94 = arith.addf %91, %93 : vector<8x64xf32>
    %95 = math.tanh %94 : vector<8x64xf32>
    %96 = tpu.concatenate %89, %95 in 0 : vector<8x64xf32>, vector<8x64xf32> -> vector<16x64xf32>
    %c0_69 = arith.constant 0 : index
    %c0_70 = arith.constant 0 : index
    %97 = vector.load %arg5[%c0_69, %c0_70] : memref<64x256xf32, #tpu.memory_space<vmem>>, vector<64x256xf32>
    %cst_71 = arith.constant dense<0.000000e+00> : vector<16x256xf32>
    %98 = tpu.matmul %96, %97, %cst_71 {dimension_numbers = #tpu.dot_dimension_numbers<[1], [0], [0], [1], [0, 0, 1, 1], [], []>} : vector<16x64xf32>, vector<64x256xf32>, vector<16x256xf32> -> vector<16x256xf32>
    %c0_72 = arith.constant 0 : index
    %c0_73 = arith.constant 0 : index
    %99 = vector.load %arg7[%c0_72, %c0_73] : memref<1x256xf32, #tpu.memory_space<vmem>>, vector<1x256xf32>
    %100 = vector.broadcast %99 : vector<1x256xf32> to vector<16x256xf32>
    %101 = arith.addf %98, %100 : vector<16x256xf32>
    %102 = vector.extract_strided_slice %101 {offsets = [0, 0], sizes = [8, 128], strides = [1, 1]} : vector<16x256xf32> to vector<8x128xf32>
    %103 = arith.negf %102 : vector<8x128xf32>
    %104 = math.exp %103 : vector<8x128xf32>
    %cst_74 = arith.constant 1.000000e+00 : f32
    %105 = vector.broadcast %cst_74 : f32 to vector<8x128xf32>
    %106 = arith.addf %105, %104 : vector<8x128xf32>
    %107 = arith.divf %105, %106 : vector<8x128xf32>
    %108 = math.tanh %102 : vector<8x128xf32>
    %109 = vector.extract_strided_slice %107 {offsets = [0, 0], sizes = [8, 32], strides = [1, 1]} : vector<8x128xf32> to vector<8x32xf32>
    %110 = vector.extract_strided_slice %108 {offsets = [0, 64], sizes = [8, 32], strides = [1, 1]} : vector<8x128xf32> to vector<8x32xf32>
    %111 = vector.extract_strided_slice %107 {offsets = [0, 96], sizes = [8, 32], strides = [1, 1]} : vector<8x128xf32> to vector<8x32xf32>
    %112 = arith.mulf %109, %110 : vector<8x32xf32>
    %113 = math.tanh %112 : vector<8x32xf32>
    %114 = arith.mulf %111, %113 : vector<8x32xf32>
    %115 = vector.extract_strided_slice %101 {offsets = [8, 128], sizes = [8, 128], strides = [1, 1]} : vector<16x256xf32> to vector<8x128xf32>
    %116 = arith.negf %115 : vector<8x128xf32>
    %117 = math.exp %116 : vector<8x128xf32>
    %cst_75 = arith.constant 1.000000e+00 : f32
    %118 = vector.broadcast %cst_75 : f32 to vector<8x128xf32>
    %119 = arith.addf %118, %117 : vector<8x128xf32>
    %120 = arith.divf %118, %119 : vector<8x128xf32>
    %121 = math.tanh %115 : vector<8x128xf32>
    %122 = vector.extract_strided_slice %120 {offsets = [0, 0], sizes = [8, 32], strides = [1, 1]} : vector<8x128xf32> to vector<8x32xf32>
    %123 = vector.extract_strided_slice %121 {offsets = [0, 64], sizes = [8, 32], strides = [1, 1]} : vector<8x128xf32> to vector<8x32xf32>
    %124 = vector.extract_strided_slice %120 {offsets = [0, 96], sizes = [8, 32], strides = [1, 1]} : vector<8x128xf32> to vector<8x32xf32>
    %125 = arith.mulf %122, %123 : vector<8x32xf32>
    %126 = math.tanh %125 : vector<8x32xf32>
    %127 = arith.mulf %124, %126 : vector<8x32xf32>
    %128 = tpu.concatenate %114, %127 in 1 : vector<8x32xf32>, vector<8x32xf32> -> vector<8x64xf32>
    %c0_76 = arith.constant 0 : index
    %c0_77 = arith.constant 0 : index
    %129 = vector.load %arg6[%c0_76, %c0_77] : memref<64x256xf32, #tpu.memory_space<vmem>>, vector<64x256xf32>
    %cst_78 = arith.constant dense<0.000000e+00> : vector<8x256xf32>
    %130 = tpu.matmul %128, %129, %cst_78 {dimension_numbers = #tpu.dot_dimension_numbers<[1], [0], [0], [1], [0, 0, 1, 1], [], []>} : vector<8x64xf32>, vector<64x256xf32>, vector<8x256xf32> -> vector<8x256xf32>
    %131 = vector.extract_strided_slice %101 {offsets = [8, 0], sizes = [8, 128], strides = [1, 1]} : vector<16x256xf32> to vector<8x128xf32>
    %132 = vector.extract_strided_slice %130 {offsets = [0, 0], sizes = [8, 128], strides = [1, 1]} : vector<8x256xf32> to vector<8x128xf32>
    %133 = arith.addf %131, %132 : vector<8x128xf32>
    %134 = arith.negf %133 : vector<8x128xf32>
    %135 = math.exp %134 : vector<8x128xf32>
    %cst_79 = arith.constant 1.000000e+00 : f32
    %136 = vector.broadcast %cst_79 : f32 to vector<8x128xf32>
    %137 = arith.addf %136, %135 : vector<8x128xf32>
    %138 = arith.divf %136, %137 : vector<8x128xf32>
    %139 = math.tanh %133 : vector<8x128xf32>
    %140 = vector.extract_strided_slice %138 {offsets = [0, 0], sizes = [8, 32], strides = [1, 1]} : vector<8x128xf32> to vector<8x32xf32>
    %141 = vector.extract_strided_slice %138 {offsets = [0, 32], sizes = [8, 32], strides = [1, 1]} : vector<8x128xf32> to vector<8x32xf32>
    %142 = vector.extract_strided_slice %139 {offsets = [0, 64], sizes = [8, 32], strides = [1, 1]} : vector<8x128xf32> to vector<8x32xf32>
    %143 = vector.extract_strided_slice %138 {offsets = [0, 96], sizes = [8, 32], strides = [1, 1]} : vector<8x128xf32> to vector<8x32xf32>
    %144 = arith.mulf %141, %112 : vector<8x32xf32>
    %145 = arith.mulf %140, %142 : vector<8x32xf32>
    %146 = arith.addf %144, %145 : vector<8x32xf32>
    %147 = math.tanh %146 : vector<8x32xf32>
    %148 = arith.mulf %143, %147 : vector<8x32xf32>
    %149 = vector.extract_strided_slice %101 {offsets = [0, 128], sizes = [8, 128], strides = [1, 1]} : vector<16x256xf32> to vector<8x128xf32>
    %150 = vector.extract_strided_slice %130 {offsets = [0, 128], sizes = [8, 128], strides = [1, 1]} : vector<8x256xf32> to vector<8x128xf32>
    %151 = arith.addf %149, %150 : vector<8x128xf32>
    %152 = arith.negf %151 : vector<8x128xf32>
    %153 = math.exp %152 : vector<8x128xf32>
    %cst_80 = arith.constant 1.000000e+00 : f32
    %154 = vector.broadcast %cst_80 : f32 to vector<8x128xf32>
    %155 = arith.addf %154, %153 : vector<8x128xf32>
    %156 = arith.divf %154, %155 : vector<8x128xf32>
    %157 = math.tanh %151 : vector<8x128xf32>
    %158 = vector.extract_strided_slice %156 {offsets = [0, 0], sizes = [8, 32], strides = [1, 1]} : vector<8x128xf32> to vector<8x32xf32>
    %159 = vector.extract_strided_slice %156 {offsets = [0, 32], sizes = [8, 32], strides = [1, 1]} : vector<8x128xf32> to vector<8x32xf32>
    %160 = vector.extract_strided_slice %157 {offsets = [0, 64], sizes = [8, 32], strides = [1, 1]} : vector<8x128xf32> to vector<8x32xf32>
    %161 = vector.extract_strided_slice %156 {offsets = [0, 96], sizes = [8, 32], strides = [1, 1]} : vector<8x128xf32> to vector<8x32xf32>
    %162 = arith.mulf %159, %125 : vector<8x32xf32>
    %163 = arith.mulf %158, %160 : vector<8x32xf32>
    %164 = arith.addf %162, %163 : vector<8x32xf32>
    %165 = math.tanh %164 : vector<8x32xf32>
    %166 = arith.mulf %161, %165 : vector<8x32xf32>
    %167 = arith.addf %114, %148 : vector<8x32xf32>
    %cst_81 = arith.constant 5.000000e-01 : f32
    %168 = vector.broadcast %cst_81 : f32 to vector<8x32xf32>
    %169 = arith.mulf %168, %167 : vector<8x32xf32>
    %170 = arith.addf %166, %127 : vector<8x32xf32>
    %cst_82 = arith.constant 5.000000e-01 : f32
    %171 = vector.broadcast %cst_82 : f32 to vector<8x32xf32>
    %172 = arith.mulf %171, %170 : vector<8x32xf32>
    %173 = tpu.concatenate %169, %172 in 1 : vector<8x32xf32>, vector<8x32xf32> -> vector<8x64xf32>
    %c0_83 = arith.constant 0 : index
    %c0_84 = arith.constant 0 : index
    %174 = vector.load %arg8[%c0_83, %c0_84] : memref<8x64xf32, #tpu.memory_space<vmem>>, vector<8x64xf32>
    tpu.vector_store %arg8[%c0_83, %c0_84], %173 {strides = array<i32>} : memref<8x64xf32, #tpu.memory_space<vmem>>, vector<8x64xf32>,
    return
  }
  func.func @transform_1(%arg0: i32, %arg1: memref<16xi32, #tpu.memory_space<smem>>) -> (i32, i32) {
    %c0_i32 = arith.constant 0 : i32
    %c0_i32_0 = arith.constant 0 : i32
    %c0_i32_1 = arith.constant 0 : i32
    return %c0_i32, %c0_i32_0 : i32, i32
  }
  func.func @transform_2(%arg0: i32, %arg1: memref<16xi32, #tpu.memory_space<smem>>) -> (i32, i32) {
    %c0_i32 = arith.constant 0 : i32
    %c0_i32_0 = arith.constant 0 : i32
    %c0_i32_1 = arith.constant 0 : i32
    return %c0_i32, %c0_i32_0 : i32, i32
  }
  func.func @transform_3(%arg0: i32, %arg1: memref<16xi32, #tpu.memory_space<smem>>) -> (i32, i32) {
    %c0_i32 = arith.constant 0 : i32
    %c0_i32_0 = arith.constant 0 : i32
    %c0_i32_1 = arith.constant 0 : i32
    return %c0_i32, %c0_i32_0 : i32, i32
  }
  func.func @transform_4(%arg0: i32, %arg1: memref<16xi32, #tpu.memory_space<smem>>) -> (i32, i32) {
    %c0_i32 = arith.constant 0 : i32
    %c0_i32_0 = arith.constant 0 : i32
    %c0_i32_1 = arith.constant 0 : i32
    return %c0_i32, %c0_i32_0 : i32, i32
  }
  func.func @transform_5(%arg0: i32, %arg1: memref<16xi32, #tpu.memory_space<smem>>) -> (i32, i32) {
    %c0_i32 = arith.constant 0 : i32
    %c0_i32_0 = arith.constant 0 : i32
    %c0_i32_1 = arith.constant 0 : i32
    return %c0_i32, %c0_i32_0 : i32, i32
  }
  func.func @transform_6(%arg0: i32, %arg1: memref<16xi32, #tpu.memory_space<smem>>) -> (i32, i32) {
    %c0_i32 = arith.constant 0 : i32
    %c0_i32_0 = arith.constant 0 : i32
    return %arg0, %c0_i32 : i32, i32
  }
}

</mosaic_0001>

<bundles_post_ra>
// kernel: tpu_custom_call.1
= control target key start
LH: loop header
LB: loop body
LE: loop exit
PB: predicated region body
PF: predicated region fallthrough
CT: control target
= control target key end

     0   :  { %s2037_s0 = inlined_call_operand.hbm [shape: s32[16], index: 0, kind: input, shape index: {}]   ;;  %s2038_s1 = inlined_call_operand.hbm [shape: f32[40,64], index: 1, kind: input, shape index: {}]   ;;  %s2039_s2 = inlined_call_operand.hbm [shape: f32[64,64], index: 2, kind: input, shape index: {}]   ;;  %s2040_s3 = inlined_call_operand.vmem [shape: f32[1,64], index: 3, kind: input, shape index: {}]   ;;  %s2041_s4 = inlined_call_operand.hbm [shape: f32[64,256], index: 4, kind: input, shape index: {}]   ;;  %s2042_s5 = inlined_call_operand.hbm [shape: f32[64,256], index: 5, kind: input, shape index: {}]   ;;  %s2043_s6 = inlined_call_operand.vmem [shape: f32[1,256], index: 6, kind: input, shape index: {}]   ;;  %s2044_s7 = inlined_call_operand.hbm [shape: f32[16,64], index: 7, kind: output, shape index: {}]  }
   0x1   :  { %2054 = sst [smem:[#allocation46_spill]] %s2039_s2  ;;  %s1209_s26 = scalar_lea.hbm %s2037_s0, 16 }
   0x2   :  { %2055 = sst [smem:[#allocation47_spill]] %s2041_s4  ;;  %p1210_p0 = scmp.ne.s32.totalorder %s2037_s0, %s1209_s26 }
   0x3   :  { %2056 = sst [smem:[#allocation48_spill]] %s2042_s5  ;;  %p1213_p1 = scmp.lt.u32.totalorder %s1209_s26, %s2037_s0 }
   0x5   :  { %p1215_p2 = pnand %p1213_p1, %p1210_p0 }
   0x7   :  { %1218 = shalt.err (!%p1215_p2)  }
   0x8   :  { %s1585_s8 = smov [#allocation5]  }
   0x9   :  { %13 = dma.hbm_to_smem %s2037_s0, 16, %s1585_s8, [#allocation4] }
   0xa   :  { %1539 = dma.done.wait [#allocation4], 16 }
   0xb   :  { %1540 = vsyncadd [#allocation4], 4294967280 }
   0xc   :  { %15 = sfence }
   0xd   :  { %16 = vsyncpa [#allocation7], 0 }
   0xe   :  { %17 = vsyncpa [#allocation10], 0 }
   0xf   :  { %18 = vsyncpa [#allocation8], 0 }
  0x10   :  { %20 = vsyncpa [#allocation8 + $0x1], 0  ;;  %s1660_s11 = smov 0   ;;  %s1662_s12 = smov 0  }
  0x11   :  { %s1664_s13 = smov 0   ;;  %s1666_s14 = smov 0  }
  0x12 LB: > { %2057 = sst [smem:[#allocation43_spill]] %s1579_s13  ;;  %s1681_s0 = sadd.s32 4294967295, %s1583_s14   ;;  %s1583_s14 = sphi %s1666_s14, %s2078_s14   ;;  %s1579_s13 = sphi %s1664_s13, %s2080_s13   ;;  %s1575_s12 = sphi %s1662_s12, %s2082_s12   ;;  %s1571_s11 = sphi %s1660_s11, %s2081_s11  }
  0x13   : > { %s974_s15 = sadd.s32 4294967294, %s1583_s14   ;;  %s1685_s16 = sadd.s32 1, %s1583_s14  }
  0x14   : > { %2058 = sst [smem:[#allocation44_spill]] %s1685_s16  ;;  %s138_s17 = sadd.s32 1, %s1579_s13 }
  0x15   : > { %s135_s18 = ssub.s32 %s1583_s14, %s1685_s16  ;;  %p148_p3 = scmp.ne.s32.totalorder %s1579_s13, %s1575_s12 }
  0x16   : > { %p136_p4 = scmp.eq.s32.totalorder %s135_s18, 0  ;;  %p149_p5 = scmp.eq.s32.totalorder %s1681_s0, 1 }
  0x17   : > { %p154_p6 = scmp.ne.s32.totalorder %s1575_s12, %s1571_s11  ;;  %p155_p7 = scmp.eq.s32.totalorder %s974_s15, 1 }
  0x18   : > { %s1696_s19 = scalar_select %p136_p4, %s1579_s13, %s138_s17  }
  0x19   : > { %p1698_p8 = por %p149_p5, %p148_p3  ;;  %p1702_p9 = por %p155_p7, %p154_p6 }
  0x1a   : > { %2059 = sst [smem:[#allocation45_spill]] %s1696_s19  ;;  %p975_p10 = scmp.ge.s32.totalorder %s1583_s14, 1 }
  0x1b   : > { %s2060_s20 = scalar_select %p1698_p8, 1, 0 }
  0x1c   : > { %s2061_s21 = scalar_select %p1702_p9, 1, 0 }
  0x1d   : > { %p162_p11 = scmp.lt.s32.totalorder %s1583_s14, 3  ;;  %p2045_p12 = scmp.eq.s32.totalorder %s1681_s0, 0 }
  0x1e   : > { %s1586_s23 = smov [#allocation9]   ;;  %s1587_s26 = smov [#allocation6]  }
  0x1f   : > { %p1709_p13 = pnand %p975_p10, %p162_p11  ;;  %s190_s24 = sshll.u32 %s1586_s23, 4  ;;  %s191_s24 = int_to_ptr.vmem [resolvable:$true] %s190_s24 }
  0x20   : > { %s174_s27 = sshll.u32 %s1587_s26, 4  ;;  %s2064_s4 = sld [smem:[#allocation47_spill]]  ;;  %s1721_s27 = int_to_ptr.vmem [resolvable:$true] %s174_s27 }
  0x21   : > { %s2062_s22 = scalar_select %p1709_p13, 1, 0 }
  0x22   : > { %p1100_p0 = pneg %p1709_p13 }
  0x24   : > { %p1717_p1 = pnand %p2045_p12, %p1100_p0 }
  0x26   : > { %s1219_s30 = scalar_lea.hbm %s2064_s4, 2048  ;;  %p1731_p3 = pneg %p1717_p1 }
  0x27   : > { %p1220_p2 = scmp.ne.s32.totalorder %s2064_s4, %s1219_s30  ;;  %p1226_p6 = scmp.lt.u32.totalorder %s1219_s30, %s2064_s4 }
  0x29   : > { %p1222_p4 = pnand %p1731_p3, %p1220_p2 }
  0x2b   : > { %p1223_p5 = pneg %p1222_p4 }
  0x2d   : > { %p1228_p7 = pnand %p1226_p6, %p1223_p5 }
  0x2f   : > { %1231 = shalt.err (!%p1228_p7)
}
  0x30   : > { %s1232_s18 = scalar_lea.vmem %s191_s24, 2048  ;;  %p1240_p12 = scmp.lt.s32.totalorder %s191_s24, %s191_s24 }
  0x31   : > { %p1233_p10 = scmp.ne.s32.totalorder %s191_s24, %s1232_s18  ;;  %p1241_p9 = scmp.lt.s32.totalorder %s1232_s18, %s1232_s18 }
  0x33   : > { %p1235_p11 = pnand %p1233_p10, %p1731_p3  ;;  %p1242_p8 = por %p1241_p9, %p1240_p12 }
  0x35   : > { %p1236_p0 = pneg %p1235_p11 }
  0x37   : > { %p1243_p13 = pnand %p1242_p8, %p1236_p0 }
  0x39   : > { %1246 = shalt.err (!%p1243_p13)
}
  0x3a   : > { %s2048_s23 = smov 256   ;;  %s2049_s26 = smov 16  }
  0x3b   : > { %1106 = dma.hbm_to_vmem [thread:$0]  (!%p1717_p1), %s2064_s4, 2048, %s191_s24, [#allocation10], %s2048_s23, %s2048_s23, %s2049_s26  }
  0x3c   : > { %s2066_s2 = sld [smem:[#allocation46_spill]] }
  0x42   : > { %s1247_s9 = scalar_lea.hbm %s2066_s2, 1024 }
  0x43   : > { %p1248_p8 = scmp.ne.s32.totalorder %s2066_s2, %s1247_s9  ;;  %p1254_p13 = scmp.lt.u32.totalorder %s1247_s9, %s2066_s2 }
  0x45   : > { %p1250_p9 = pnand %p1248_p8, %p1731_p3 }
  0x47   : > { %p1251_p12 = pneg %p1250_p9 }
  0x49   : > { %p1256_p2 = pnand %p1254_p13, %p1251_p12 }
  0x4b   : > { %1259 = shalt.err (!%p1256_p2)
}
  0x4c   : > { %s1260_s24 = scalar_lea.vmem %s1721_s27, 1024  ;;  %p1268_p7 = scmp.lt.s32.totalorder %s1721_s27, %s1721_s27 }
  0x4d   : > { %p1261_p4 = scmp.ne.s32.totalorder %s1721_s27, %s1260_s24  ;;  %p1269_p10 = scmp.lt.s32.totalorder %s1260_s24, %s1260_s24 }
  0x4f   : > { %p1263_p5 = pnand %p1261_p4, %p1731_p3  ;;  %p1270_p11 = por %p1269_p10, %p1268_p7 }
  0x51   : > { %p1264_p6 = pneg %p1263_p5 }
  0x53   : > { %p1271_p0 = pnand %p1270_p11, %p1264_p6 }
  0x55   : > { %1274 = shalt.err (!%p1271_p0)
}
  0x56   : > { %s1590_s28 = smov 128   ;;  %s1591_s19 = smov 8  }
  0x57   : > { %1103 = dma.hbm_to_vmem [thread:$0]  (!%p1717_p1), %s2066_s2, 1024, %s1721_s27, [#allocation7], %s1590_s28, %s1590_s28, %s1591_s19  }
  0x58   : > { %s1592_s8 = smov [#allocation11]   ;;  %s2067_s5 = sld [smem:[#allocation48_spill]] }
  0x59   : > { %s203_s9 = sshll.u32 %s1592_s8, 4  ;;  %s204_s9 = int_to_ptr.vmem [resolvable:$true] %s203_s9 }
  0x5e   : > { %s1275_s18 = scalar_lea.hbm %s2067_s5, 2048 }
  0x5f   : > { %p1276_p8 = scmp.ne.s32.totalorder %s2067_s5, %s1275_s18  ;;  %p1282_p13 = scmp.lt.u32.totalorder %s1275_s18, %s2067_s5 }
  0x61   : > { %p1278_p9 = pnand %p1276_p8, %p1731_p3 }
  0x63   : > { %p1279_p12 = pneg %p1278_p9 }
  0x65   : > { %p1284_p2 = pnand %p1282_p13, %p1279_p12 }
  0x67   : > { %1287 = shalt.err (!%p1284_p2)
}
  0x68   : > { %s1288_s27 = scalar_lea.vmem %s204_s9, 2048  ;;  %p1296_p7 = scmp.lt.s32.totalorder %s204_s9, %s204_s9 }
  0x69   : > { %p1289_p4 = scmp.ne.s32.totalorder %s204_s9, %s1288_s27  ;;  %p1297_p10 = scmp.lt.s32.totalorder %s1288_s27, %s1288_s27 }
  0x6b   : > { %p1291_p5 = pnand %p1289_p4, %p1731_p3  ;;  %p1298_p11 = por %p1297_p10, %p1296_p7 }
  0x6d   : > { %p1292_p6 = pneg %p1291_p5 }
  0x6f   : > { %p1299_p0 = pnand %p1298_p11, %p1292_p6 }
  0x71   : > { %1302 = shalt.err (!%p1299_p0)
}
  0x72   : > { %s2068_s23 = smov 16   ;;  %s2069_s28 = smov 256  }
  0x73   : > { %1109 = dma.hbm_to_vmem [thread:$0]  (!%p1717_p1), %s2067_s5, 2048, %s204_s9, [#allocation10], %s2069_s28, %s2069_s28, %s2068_s23  }
  0x74   : > { %p2070_p8 = scmp.ne.s32.totalorder %s2062_s22, 0 }
  0x75   : > { %p2071_p3 = scmp.eq.s32.totalorder (!%p2070_p8), %s1681_s0, 0 }
  0x76   : > { %222 = sbr.rel (%p2070_p8) target bundleno = 1879 (0x757), region = 40 }
  0x7d   : > { %1542 = dma.done.wait (%p2071_p3), [#allocation7], 1024   ;;  %p2072_p9 = pmov %p2071_p3 }
  0x7e   : > { %p2073_p12 = pmov %p2071_p3 }
  0x7f   : > { %1544 = vsyncadd (%p2072_p9), [#allocation7], 4294966272 }
  0x80   : > { %1546 = dma.done.wait (%p2073_p12), [#allocation10], 4096   ;;  %p2074_p13 = pmov %p2071_p3 }
  0x81   : > { %s2050_s25 = sand.u32 1, %s1575_s12   ;;  %s1806_s10 = sshll.u32 %s1681_s0, 3 }
  0x82   : > { %1548 = vsyncadd (%p2074_p13), [#allocation10], 4294963200  ;;  %s1810_s22 = sshll.u32 %s2050_s25, 3  ;;  %s254_s19 = sld [smem:[#allocation5 + %s1806_s10]] }
  0x83   : > { %s1593_s29 = smov [#allocation2]   ;;  %s268_s8 = sadd.s32 1, %s1806_s10 }
  0x84   : > { %s264_s30 = sshll.u32 %s1593_s29, 4  ;;  %s1816_s9 = sld [smem:[#allocation5 + %s268_s8]]  ;;  %s1814_s30 = int_to_ptr.vmem [resolvable:$true] %s264_s30 }
  0x85   : > { %s285_s15 = sadd.s32 2, %s1806_s10  ;;  %s1594_s17 = smov [#allocation2 + $0x1]  }
  0x86   : > { %s281_s18 = sshll.u32 %s1594_s17, 4  ;;  %s1819_s24 = sld [smem:[#allocation5 + %s285_s15]]  ;;  %s1821_s18 = int_to_ptr.vmem [resolvable:$true] %s281_s18 }
  0x87   : > { %s1829_s2 = scalar_lea.hbm %s2038_s1, 640 }
  0x88   : > { %s985_s27 = sshll.u32 %s254_s19, 4 }
  0x89   : > { %s256_s4 = scalar_lea.hbm %s2038_s1, %s985_s27 }
  0x8a   : > { %s1303_s26 = scalar_lea.hbm %s256_s4, 16  ;;  %p1306_p2 = scmp.lt.u32.totalorder %s256_s4, %s2038_s1 }
  0x8b   : > { %p1304_p1 = scmp.ne.s32.totalorder %s256_s4, %s1303_s26  ;;  %p1307_p4 = scmp.lt.u32.totalorder %s1829_s2, %s1303_s26 }
  0x8c   : > { %p1309_p6 = scmp.lt.u32.totalorder %s1303_s26, %s256_s4 }
  0x8d   : > { %p1308_p5 = por %p1307_p4, %p1306_p2 }
  0x8f   : > { %p1310_p7 = por %p1309_p6, %p1308_p5 }
  0x91   : > { %p1311_p10 = pnand %p1310_p7, %p1304_p1 }
  0x93   : > { %1314 = shalt.err (!%p1311_p10)  }
  0x94   : > { %s1315_s19 = scalar_lea.vmem %s1814_s30, 16  ;;  %s1838_s25 = scalar_lea.vmem %s1814_s30, 128 }
  0x95   : > { %p1316_p11 = scmp.ne.s32.totalorder %s1814_s30, %s1315_s19  ;;  %p1320_p0 = scmp.lt.s32.totalorder %s1814_s30, %s1814_s30 }
  0x96   : > { %p1321_p8 = scmp.lt.s32.totalorder %s1838_s25, %s1315_s19 }
  0x98   : > { %p1322_p3 = por %p1321_p8, %p1320_p0 }
  0x9a   : > { %p1323_p9 = pnand %p1322_p3, %p1316_p11 }
  0x9c   : > { %1326 = shalt.err (!%p1323_p9)  }
  0x9d   : > { %267 = dma.hbm_to_vmem [thread:$0]  %s256_s4, 16, %s1814_s30, [#allocation3] }
  0x9e   : > { %s986_s5 = sshll.u32 %s1816_s9, 4  ;;  %s1595_s15 = smov [#allocation2 + $0x2]  }
  0x9f   : > { %s298_s17 = sshll.u32 %s1595_s15, 4  ;;  %s271_s28 = scalar_lea.hbm %s2038_s1, %s986_s5  ;;  %s1848_s17 = int_to_ptr.vmem [resolvable:$true] %s298_s17 }
  0xa0   : > { %s1327_s26 = scalar_lea.hbm %s271_s28, 16  ;;  %p1330_p13 = scmp.lt.u32.totalorder %s271_s28, %s2038_s1 }
  0xa1   : > { %p1328_p12 = scmp.ne.s32.totalorder %s271_s28, %s1327_s26  ;;  %p1331_p1 = scmp.lt.u32.totalorder %s1829_s2, %s1327_s26 }
  0xa2   : > { %p1333_p4 = scmp.lt.u32.totalorder %s1327_s26, %s271_s28 }
  0xa3   : > { %p1332_p2 = por %p1331_p1, %p1330_p13 }
  0xa5   : > { %p1334_p5 = por %p1333_p4, %p1332_p2 }
  0xa7   : > { %p1335_p6 = pnand %p1334_p5, %p1328_p12 }
  0xa9   : > { %1338 = shalt.err (!%p1335_p6)  }
  0xaa   : > { %s1339_s9 = scalar_lea.vmem %s1821_s18, 16  ;;  %p1344_p10 = scmp.lt.s32.totalorder %s1821_s18, %s1814_s30 }
  0xab   : > { %p1340_p7 = scmp.ne.s32.totalorder %s1821_s18, %s1339_s9  ;;  %p1345_p11 = scmp.lt.s32.totalorder %s1838_s25, %s1339_s9 }
  0xad   : > { %p1346_p0 = por %p1345_p11, %p1344_p10 }
  0xaf   : > { %p1347_p8 = pnand %p1346_p0, %p1340_p7 }
  0xb1   : > { %1350 = shalt.err (!%p1347_p8)  }
  0xb2   : > { %284 = dma.hbm_to_vmem [thread:$0]  %s271_s28, 16, %s1821_s18, [#allocation3 + $0x1] }
  0xb3   : > { %s987_s4 = sshll.u32 %s1819_s24, 4  ;;  %s302_s19 = sadd.s32 3, %s1806_s10 }
  0xb4   : > { %s288_s27 = scalar_lea.hbm %s2038_s1, %s987_s4  ;;  %s1865_s23 = sld [smem:[#allocation5 + %s302_s19]] }
  0xb5   : > { %s1351_s26 = scalar_lea.hbm %s288_s27, 16  ;;  %p1354_p9 = scmp.lt.u32.totalorder %s288_s27, %s2038_s1 }
  0xb6   : > { %p1352_p3 = scmp.ne.s32.totalorder %s288_s27, %s1351_s26  ;;  %p1355_p12 = scmp.lt.u32.totalorder %s1829_s2, %s1351_s26 }
  0xb7   : > { %p1357_p1 = scmp.lt.u32.totalorder %s1351_s26, %s288_s27 }
  0xb8   : > { %p1356_p13 = por %p1355_p12, %p1354_p9 }
  0xba   : > { %p1358_p2 = por %p1357_p1, %p1356_p13 }
  0xbc   : > { %p1359_p4 = pnand %p1358_p2, %p1352_p3 }
  0xbe   : > { %1362 = shalt.err (!%p1359_p4)  }
  0xbf   : > { %s1363_s18 = scalar_lea.vmem %s1848_s17, 16  ;;  %p1368_p6 = scmp.lt.s32.totalorder %s1848_s17, %s1814_s30 }
  0xc0   : > { %p1364_p5 = scmp.ne.s32.totalorder %s1848_s17, %s1363_s18  ;;  %p1369_p7 = scmp.lt.s32.totalorder %s1838_s25, %s1363_s18 }
  0xc2   : > { %p1370_p10 = por %p1369_p7, %p1368_p6 }
  0xc4   : > { %p1371_p11 = pnand %p1370_p10, %p1364_p5 }
  0xc6   : > { %1374 = shalt.err (!%p1371_p11)  }
  0xc7   : > { %301 = dma.hbm_to_vmem [thread:$0]  %s288_s27, 16, %s1848_s17, [#allocation3 + $0x2] }
  0xc8   : > { %s319_s24 = sadd.s32 4, %s1806_s10  ;;  %s1596_s28 = smov [#allocation2 + $0x3]  }
  0xc9   : > { %s315_s9 = sshll.u32 %s1596_s28, 4  ;;  %s320_s4 = sld [smem:[#allocation5 + %s319_s24]]  ;;  %s316_s9 = int_to_ptr.vmem [resolvable:$true] %s315_s9 }
  0xca   : > { %s1597_s19 = smov [#allocation2 + $0x4]   ;;  %s336_s15 = sadd.s32 5, %s1806_s10 }
  0xcb   : > { %s332_s5 = sshll.u32 %s1597_s19, 4  ;;  %s988_s26 = sshll.u32 %s1865_s23, 4  ;;  %s1880_s5 = int_to_ptr.vmem [resolvable:$true] %s332_s5 }
  0xcc   : > { %s305_s18 = scalar_lea.hbm %s2038_s1, %s988_s26  ;;  %s1885_s13 = sld [smem:[#allocation5 + %s336_s15]] }
  0xcd   : > { %s1375_s16 = scalar_lea.hbm %s305_s18, 16  ;;  %p1378_p8 = scmp.lt.u32.totalorder %s305_s18, %s2038_s1 }
  0xce   : > { %p1376_p0 = scmp.ne.s32.totalorder %s305_s18, %s1375_s16  ;;  %p1379_p3 = scmp.lt.u32.totalorder %s1829_s2, %s1375_s16 }
  0xcf   : > { %p1381_p12 = scmp.lt.u32.totalorder %s1375_s16, %s305_s18 }
  0xd0   : > { %p1380_p9 = por %p1379_p3, %p1378_p8 }
  0xd2   : > { %p1382_p13 = por %p1381_p12, %p1380_p9 }
  0xd4   : > { %p1383_p1 = pnand %p1382_p13, %p1376_p0 }
  0xd6   : > { %1386 = shalt.err (!%p1383_p1)  }
  0xd7   : > { %s1387_s23 = scalar_lea.vmem %s316_s9, 16  ;;  %p1392_p4 = scmp.lt.s32.totalorder %s316_s9, %s1814_s30 }
  0xd8   : > { %p1388_p2 = scmp.ne.s32.totalorder %s316_s9, %s1387_s23  ;;  %p1393_p5 = scmp.lt.s32.totalorder %s1838_s25, %s1387_s23 }
  0xda   : > { %p1394_p6 = por %p1393_p5, %p1392_p4 }
  0xdc   : > { %p1395_p7 = pnand %p1394_p6, %p1388_p2 }
  0xde   : > { %1398 = shalt.err (!%p1395_p7)  }
  0xdf   : > { %318 = dma.hbm_to_vmem [thread:$0]  %s305_s18, 16, %s316_s9, [#allocation3 + $0x3] }
  0xe0   : > { %s989_s24 = sshll.u32 %s320_s4, 4  ;;  %s1598_s16 = smov [#allocation2 + $0x5]  }
  0xe1   : > { %s322_s15 = scalar_lea.hbm %s2038_s1, %s989_s24  ;;  %s349_s26 = sshll.u32 %s1598_s16, 4  ;;  %s350_s26 = int_to_ptr.vmem [resolvable:$true] %s349_s26 }
  0xe2   : > { %s1399_s29 = scalar_lea.hbm %s322_s15, 16  ;;  %p1402_p11 = scmp.lt.u32.totalorder %s322_s15, %s2038_s1 }
  0xe3   : > { %p1400_p10 = scmp.ne.s32.totalorder %s322_s15, %s1399_s29  ;;  %p1403_p0 = scmp.lt.u32.totalorder %s1829_s2, %s1399_s29 }
  0xe4   : > { %p1405_p3 = scmp.lt.u32.totalorder %s1399_s29, %s322_s15 }
  0xe5   : > { %p1404_p8 = por %p1403_p0, %p1402_p11 }
  0xe7   : > { %p1406_p9 = por %p1405_p3, %p1404_p8 }
  0xe9   : > { %p1407_p12 = pnand %p1406_p9, %p1400_p10 }
  0xeb   : > { %1410 = shalt.err (!%p1407_p12)  }
  0xec   : > { %s1411_s9 = scalar_lea.vmem %s1880_s5, 16  ;;  %p1416_p1 = scmp.lt.s32.totalorder %s1880_s5, %s1814_s30 }
  0xed   : > { %p1412_p13 = scmp.ne.s32.totalorder %s1880_s5, %s1411_s9  ;;  %p1417_p2 = scmp.lt.s32.totalorder %s1838_s25, %s1411_s9 }
  0xef   : > { %p1418_p4 = por %p1417_p2, %p1416_p1 }
  0xf1   : > { %p1419_p5 = pnand %p1418_p4, %p1412_p13 }
  0xf3   : > { %1422 = shalt.err (!%p1419_p5)  }
  0xf4   : > { %335 = dma.hbm_to_vmem [thread:$0]  %s322_s15, 16, %s1880_s5, [#allocation3 + $0x4] }
  0xf5   : > { %s353_s4 = sadd.s32 6, %s1806_s10  ;;  %s990_s18 = sshll.u32 %s1885_s13, 4 }
  0xf6   : > { %s354_s27 = sld [smem:[#allocation5 + %s353_s4]]  ;;  %s339_s28 = scalar_lea.hbm %s2038_s1, %s990_s18 }
  0xf7   : > { %s1423_s19 = scalar_lea.hbm %s339_s28, 16  ;;  %p1426_p7 = scmp.lt.u32.totalorder %s339_s28, %s2038_s1 }
  0xf8   : > { %p1424_p6 = scmp.ne.s32.totalorder %s339_s28, %s1423_s19  ;;  %p1427_p10 = scmp.lt.u32.totalorder %s1829_s2, %s1423_s19 }
  0xf9   : > { %p1429_p0 = scmp.lt.u32.totalorder %s1423_s19, %s339_s28 }
  0xfa   : > { %p1428_p11 = por %p1427_p10, %p1426_p7 }
  0xfc   : > { %p1430_p8 = por %p1429_p0, %p1428_p11 }
  0xfe   : > { %p1431_p3 = pnand %p1430_p8, %p1424_p6 }
 0x100   : > { %1434 = shalt.err (!%p1431_p3)  }
 0x101   : > { %s1435_s5 = scalar_lea.vmem %s350_s26, 16  ;;  %p1440_p12 = scmp.lt.s32.totalorder %s350_s26, %s1814_s30 }
 0x102   : > { %p1436_p9 = scmp.ne.s32.totalorder %s350_s26, %s1435_s5  ;;  %p1441_p13 = scmp.lt.s32.totalorder %s1838_s25, %s1435_s5 }
 0x104   : > { %p1442_p1 = por %p1441_p13, %p1440_p12 }
 0x106   : > { %p1443_p2 = pnand %p1442_p1, %p1436_p9 }
 0x108   : > { %1446 = shalt.err (!%p1443_p2)  }
 0x109   : > { %352 = dma.hbm_to_vmem [thread:$0]  %s339_s28, 16, %s350_s26, [#allocation3 + $0x5] }
 0x10a   : > { %s1599_s13 = smov [#allocation2 + $0x6]   ;;  %s370_s8 = sadd.s32 7, %s1806_s10 }
 0x10b   : > { %s366_s15 = sshll.u32 %s1599_s13, 4  ;;  %s371_s17 = sld [smem:[#allocation5 + %s370_s8]]  ;;  %s367_s15 = int_to_ptr.vmem [resolvable:$true] %s366_s15 }
 0x10c   : > { %s991_s9 = sshll.u32 %s354_s27, 4  ;;  %s1600_s4 = smov [#allocation2 + $0x7]  }
 0x10d   : > { %s383_s18 = sshll.u32 %s1600_s4, 4  ;;  %s356_s19 = scalar_lea.hbm %s2038_s1, %s991_s9  ;;  %s384_s18 = int_to_ptr.vmem [resolvable:$true] %s383_s18 }
 0x10e   : > { %s1447_s16 = scalar_lea.hbm %s356_s19, 16  ;;  %p1450_p5 = scmp.lt.u32.totalorder %s356_s19, %s2038_s1 }
 0x10f   : > { %p1448_p4 = scmp.ne.s32.totalorder %s356_s19, %s1447_s16  ;;  %p1451_p6 = scmp.lt.u32.totalorder %s1829_s2, %s1447_s16 }
 0x110   : > { %p1453_p10 = scmp.lt.u32.totalorder %s1447_s16, %s356_s19 }
 0x111   : > { %p1452_p7 = por %p1451_p6, %p1450_p5 }
 0x113   : > { %p1454_p11 = por %p1453_p10, %p1452_p7 }
 0x115   : > { %p1455_p0 = pnand %p1454_p11, %p1448_p4 }
 0x117   : > { %1458 = shalt.err (!%p1455_p0)  }
 0x118   : > { %s1459_s10 = scalar_lea.vmem %s367_s15, 16  ;;  %p1464_p3 = scmp.lt.s32.totalorder %s367_s15, %s1814_s30 }
 0x119   : > { %p1460_p8 = scmp.ne.s32.totalorder %s367_s15, %s1459_s10  ;;  %p1465_p9 = scmp.lt.s32.totalorder %s1838_s25, %s1459_s10 }
 0x11b   : > { %p1466_p12 = por %p1465_p9, %p1464_p3 }
 0x11d   : > { %p1467_p13 = pnand %p1466_p12, %p1460_p8 }
 0x11f   : > { %1470 = shalt.err (!%p1467_p13)  }
 0x120   : > { %369 = dma.hbm_to_vmem [thread:$0]  %s356_s19, 16, %s367_s15, [#allocation3 + $0x6] }
 0x121   : > { %s992_s26 = sshll.u32 %s371_s17, 4 }
 0x122   : > { %s373_s13 = scalar_lea.hbm %s2038_s1, %s992_s26 }
 0x123   : > { %s1471_s8 = scalar_lea.hbm %s373_s13, 16  ;;  %p1474_p2 = scmp.lt.u32.totalorder %s373_s13, %s2038_s1 }
 0x124   : > { %p1472_p1 = scmp.ne.s32.totalorder %s373_s13, %s1471_s8  ;;  %p1475_p4 = scmp.lt.u32.totalorder %s1829_s2, %s1471_s8 }
 0x125   : > { %p1477_p6 = scmp.lt.u32.totalorder %s1471_s8, %s373_s13 }
 0x126   : > { %p1476_p5 = por %p1475_p4, %p1474_p2 }
 0x128   : > { %p1478_p7 = por %p1477_p6, %p1476_p5 }
 0x12a   : > { %p1479_p10 = pnand %p1478_p7, %p1472_p1 }
 0x12c   : > { %1482 = shalt.err (!%p1479_p10)  }
 0x12d   : > { %s1483_s15 = scalar_lea.vmem %s384_s18, 16  ;;  %p1488_p0 = scmp.lt.s32.totalorder %s384_s18, %s1814_s30 }
 0x12e   : > { %p1484_p11 = scmp.ne.s32.totalorder %s384_s18, %s1483_s15  ;;  %p1489_p8 = scmp.lt.s32.totalorder %s1838_s25, %s1483_s15 }
 0x130   : > { %p1490_p3 = por %p1489_p8, %p1488_p0 }
 0x132   : > { %p1491_p9 = pnand %p1490_p3, %p1484_p11 }
 0x134   : > { %1494 = shalt.err (!%p1491_p9)  }
 0x135   : > { %386 = dma.hbm_to_vmem [thread:$0]  %s373_s13, 16, %s384_s18, [#allocation3 + $0x7] }
 0x136   : > { %s252_s17 = scalar_lea.vmem [#allocation12], %s1810_s22 }
 0x137   : > { %1549 = dma.done.wait [#allocation3], 16 }
 0x138   : > { %1550 = vsyncadd [#allocation3], 4294967280 }
 0x139   : > { %1551 = dma.done.wait [#allocation3 + $0x1], 16 }
 0x13a   : > { %1552 = vsyncadd [#allocation3 + $0x1], 4294967280 }
 0x13b   : > { %1553 = dma.done.wait [#allocation3 + $0x2], 16 }
 0x13c   : > { %1554 = vsyncadd [#allocation3 + $0x2], 4294967280 }
 0x13d   : > { %1555 = dma.done.wait [#allocation3 + $0x3], 16 }
 0x13e   : > { %1556 = vsyncadd [#allocation3 + $0x3], 4294967280 }
 0x13f   : > { %1557 = dma.done.wait [#allocation3 + $0x4], 16 }
 0x140   : > { %1558 = vsyncadd [#allocation3 + $0x4], 4294967280 }
 0x141   : > { %1559 = dma.done.wait [#allocation3 + $0x5], 16 }
 0x142   : > { %1560 = vsyncadd [#allocation3 + $0x5], 4294967280 }
 0x143   : > { %1561 = dma.done.wait [#allocation3 + $0x6], 16 }
 0x144   : > { %1562 = vsyncadd [#allocation3 + $0x6], 4294967280 }
 0x145   : > { %1563 = dma.done.wait [#allocation3 + $0x7], 16 }
 0x146   : > { %1564 = vsyncadd [#allocation3 + $0x7], 4294967280  ;;  %v1601_v0 = vmov 0.0|0.0   ;;  %vm1602_vm0 = vmmov 0   ;;  %v1603_v1 = vmov 0.0   ;;  %v405_v2 = vld [vmem:[#allocation6] sm:$0xff]  ;;  %v513_v39 = vlaneseq }
 0x147   : > { %1042 = vmatprep.subr.bf16.mxu0 %v1601_v0  ;;  %1039 = vmatprep.mubr.msk.f32.mxu0 %vm1602_vm0, %v1603_v1  ;;  %v406_v3 = vld [vmem:[#allocation6 + $0x8] sm:$0xff]  ;;  %v498_v6 = vld [vmem:[#allocation9 + $0x18] sm:$0xff]  ;;  %v495_v7 = vld [vmem:[#allocation9] sm:$0xff]  ;;  %vm420_vm1 = vcmask 523264   ;;  %s1604_s23 = smov 64   ;;  %s1605_s24 = smov 96  }
 0x148   : > { %590 = vmatprep.mubr.f32.mxu1 %v1603_v1  ;;  %v496_v4 = vld [vmem:[#allocation9 + $0x8] sm:$0xff]  ;;  %v1043_v5 = vpack.c.bf16 %v406_v3, %v405_v2  ;;  %v497_v8 = vld [vmem:[#allocation9 + $0x10] sm:$0xff]  ;;  %v408_v12 = vld [vmem:[#allocation6 + $0x18] sm:$0xff]  ;;  %v514_v40 = vshrl.u32 %v513_v39, 7  ;;  %s1606_s19 = smov 32   ;;  %vm647_vm2 = vcmask 261120  }
 0x149   : > { %v1054_v9 = vpack.c.bf16 %v498_v6, %v496_v4  ;;  %v1056_v10 = vpack.c.bf16 %v497_v8, %v495_v7  ;;  %v407_v11 = vld [vmem:[#allocation6 + $0x10] sm:$0xff]  ;;  %v500_v13 = vld [vmem:[#allocation9 + $0x28] sm:$0xff]  ;;  %v502_v15 = vld [vmem:[#allocation9 + $0x38] sm:$0xff]  ;;  %s1003_s16 = sshll.u32 %s1681_s0, 7  ;;  %s825_s29 = sshll.u32 %s252_s17, 4  ;;  %s1991_s29 = int_to_ptr.vmem [resolvable:$true] %s825_s29 }
 0x14a   : > { %1044 = vmatpush3.bf16.msra.mxu0 %v1043_v5  ;;  %v1046_v14 = vpack.c.bf16 %v408_v12, %v407_v11  ;;  %v499_v16 = vld [vmem:[#allocation9 + $0x20] sm:$0xff]  ;;  %v501_v17 = vld [vmem:[#allocation9 + $0x30] sm:$0xff]  ;;  %v1058_v18 = vpack.c.bf16 %v502_v15, %v500_v13  ;;  %v410_v20 = vld [vmem:[#allocation6 + $0x28] sm:$0xff]  ;;  %v515_v41 = vsub.s32 0, %v514_v40  ;;  %v519_v60 = vsub.s32 1, %v514_v40  ;;  %s1989_s26 = scalar_lea.hbm %s2044_s7, %s1003_s16  ;;  %s2075_s0 = sand.u32 1, %s1575_s12  }
 0x14b   : > { %1055 = vmatprep.subr.bf16.mxu1 %v1054_v9  ;;  %1045 = vmatprep.subr.bf16.mxu0 %v1601_v0  ;;  %v409_v19 = vld [vmem:[#allocation6 + $0x20] sm:$0xff]  ;;  %v504_v21 = vld [vmem:[#allocation9 + $0x48] sm:$0xff]  ;;  %v1060_v22 = vpack.c.bf16 %v501_v17, %v499_v16  ;;  %v506_v23 = vld [vmem:[#allocation9 + $0x58] sm:$0xff]  ;;  %s812_s27 = scalar_lea.sflag [#allocation8], %s2075_s0  ;;  %s1495_s28 = scalar_lea.vmem %s1991_s29, 128 }
 0x14c   : > { %1057 = vmatpush1.bf16.msra.mxu1 %v1056_v10  ;;  %v1062_v24 = vpack.c.bf16 %v506_v23, %v504_v21  ;;  %v503_v25 = vld [vmem:[#allocation9 + $0x40] sm:$0xff]  ;;  %v505_v26 = vld [vmem:[#allocation9 + $0x50] sm:$0xff]  ;;  %v1049_v27 = vpack.c.bf16 %v410_v20, %v409_v19  ;;  %v508_v28 = vld [vmem:[#allocation9 + $0x68] sm:$0xff]  ;;  %p1496_p12 = scmp.ne.s32.totalorder %s1991_s29, %s1495_s28  ;;  %p2076_p13 = scmp.ne.s32.totalorder %s2060_s20, 0 }
 0x14d   : > { %1059 = vmatprep.subr.bf16.mxu1 %v1058_v18  ;;  %v510_v29 = vld [vmem:[#allocation9 + $0x78] sm:$0xff]  ;;  %v411_v30 = vld [vmem:[#allocation6 + $0x30] sm:$0xff]  ;;  %v1064_v32 = vpack.c.bf16 %v505_v26, %v503_v25  ;;  %v507_v34 = vld [vmem:[#allocation9 + $0x60] sm:$0xff]  ;;  %s1607_s13 = smov [#allocation12]  }
 0x14e   : > { %1047 = vmatpush3.bf16.msra.mxu0 %v1046_v14  ;;  %v412_v31 = vld [vmem:[#allocation6 + $0x38] sm:$0xff]  ;;  %v1066_v33 = vpack.c.bf16 %v510_v29, %v508_v28  ;;  %v509_v35 = vld [vmem:[#allocation9 + $0x70] sm:$0xff]  ;;  %v650_v10 = vld [vmem:[#allocation11 + $0x8] sm:$0xff]  ;;  %p1497_p1 = pnand %p1496_p12, %p2076_p13  ;;  %s1499_s8 = sshll.u32 %s1607_s13, 4  ;;  %s1500_s8 = int_to_ptr.vmem [resolvable:$false] %s1499_s8 }
 0x14f   : > { %1048 = vmatprep.subr.bf16.mxu0 %v1601_v0  ;;  %v1052_v36 = vpack.c.bf16 %v412_v31, %v411_v30  ;;  %v1068_v37 = vpack.c.bf16 %v509_v35, %v507_v34  ;;  %v404_v38 = vld [vmem:[#allocation2] sm:$0xff]  ;;  %v511_v42 = vld [vmem:[%s2043_s6] sm:$0x3]  ;;  %v649_v12 = vld [vmem:[#allocation11] sm:$0xff]  ;;  %s1501_s9 = scalar_lea.vmem %s1500_s8, 256  ;;  %p1502_p4 = scmp.lt.s32.totalorder %s1991_s29, %s1500_s8 }
 0x150   : > { %1061 = vmatpush1.bf16.msra.mxu1 %v1060_v22  ;;  %v993_v43 = vld [vmem:[%s2040_s3] ss:$0 sm:$0xff]  ;;  %v1945_v44 = vrot.slane %v511_v42, %v515_v41  ;;  %v1956_v61 = vrot.slane %v511_v42, %v519_v60  ;;  %v652_v11 = vld [vmem:[#allocation11 + $0x18] sm:$0xff]  ;;  %v654_v15 = vld [vmem:[#allocation11 + $0x28] sm:$0xff]  ;;  %p1498_p2 = pneg %p1497_p1  ;;  %p1503_p5 = scmp.lt.s32.totalorder %s1501_s9, %s1495_s28 }
 0x151   : > { %1063 = vmatprep.subr.bf16.mxu1 %v1062_v24  ;;  %v1070_v13 = vpack.c.bf16 %v652_v11, %v650_v10  ;;  %v651_v14 = vld [vmem:[#allocation11 + $0x10] sm:$0xff]  ;;  %v656_v16 = vld [vmem:[#allocation11 + $0x38] sm:$0xff]  ;;  %v653_v19 = vld [vmem:[#allocation11 + $0x20] sm:$0xff] }
 0x152   : > { %1050 = vmatpush3.bf16.msra.mxu0 %v1049_v27  ;;  %v1072_v17 = vpack.c.bf16 %v651_v14, %v649_v12  ;;  %v1074_v18 = vpack.c.bf16 %v656_v16, %v654_v15  ;;  %v655_v20 = vld [vmem:[#allocation11 + $0x30] sm:$0xff]  ;;  %v658_v21 = vld [vmem:[#allocation11 + $0x48] sm:$0xff]  ;;  %v660_v22 = vld [vmem:[#allocation11 + $0x58] sm:$0xff]  ;;  %p1504_p6 = por %p1503_p5, %p1502_p4 }
 0x153   : > { %1051 = vmatprep.subr.bf16.mxu0 %v1601_v0  ;;  %v1076_v23 = vpack.c.bf16 %v655_v20, %v653_v19  ;;  %v1078_v24 = vpack.c.bf16 %v660_v22, %v658_v21  ;;  %v657_v25 = vld [vmem:[#allocation11 + $0x40] sm:$0xff]  ;;  %v659_v26 = vld [vmem:[#allocation11 + $0x50] sm:$0xff]  ;;  %v662_v27 = vld [vmem:[#allocation11 + $0x68] sm:$0xff] }
 0x154   : > { %1065 = vmatpush1.bf16.msra.mxu1 %v1064_v32  ;;  %v664_v28 = vld [vmem:[#allocation11 + $0x78] sm:$0xff]  ;;  %v1080_v29 = vpack.c.bf16 %v659_v26, %v657_v25  ;;  %v661_v31 = vld [vmem:[#allocation11 + $0x60] sm:$0xff]  ;;  %v663_v32 = vld [vmem:[#allocation11 + $0x70] sm:$0xff]  ;;  %p1505_p7 = pnand %p1504_p6, %p1498_p2 }
 0x155   : > { %1067 = vmatprep.subr.bf16.mxu1 %v1066_v33  ;;  %v1082_v30 = vpack.c.bf16 %v664_v28, %v662_v27  ;;  %v1084_v34 = vpack.c.bf16 %v663_v32, %v661_v31 }
 0x156   : > { %1053 = vmatpush3.bf16.msra.mxu0 %v1052_v36 }
 0x157   : > { %1071 = vmatprep.subr.bf16.mxu0 %v1070_v13 }
 0x158   : > { %1069 = vmatpush1.bf16.msra.mxu1 %v1068_v37 }
 0x159   : > { %1040 = vmatmul.mubr.msk.f32.vlgmr.msra.gmra.mrb[0].mxu0 %vm420_vm1, %v404_v38 }
 0x15a   : > { %732 = vmatprep.mubr.f32.mxu0 %v1603_v1  ;;  %1073 = vmatpush1.bf16.msra.mxu0 %v1072_v17 }
 0x15b   : > { %995 = vmatmul.mubr.msk.f32.vlgmr.msra.gmra.mrb[0].mxu1 %vm420_vm1, %v404_v38  ;;  %1075 = vmatprep.subr.bf16.mxu0 %v1074_v18 }
 0x15c   : > { %596 = vmatprep.mubr.f32.mxu1 %v1603_v1 }
 0x15e   : > { %1077 = vmatpush1.bf16.msra.mxu0 %v1076_v23 }
 0x15f   : > { %1079 = vmatprep.subr.bf16.mxu0 %v1078_v24 }
 0x162   : > { %1081 = vmatpush1.bf16.msra.mxu0 %v1080_v29 }
 0x163   : > { %1083 = vmatprep.subr.bf16.mxu0 %v1082_v30 }
 0x166   : > { %1085 = vmatpush1.bf16.msra.mxu0 %v1084_v34 }
 0x22c   : > { %v490_v45 = vpop.f32.mrb[0].mxu0 }
 0x22d   : > { %v491_v46 = vadd.f32 %v993_v43, %v490_v45  ;;  %v1041_v47 = vpop.f32.mrb[1].mxu0 }
 0x22e   : > { %v592_v48 = vpop.f32.mrb[0].mxu1 }
 0x22f   : > { %1175 = vtanh.f32 %v491_v46  ;;  %v593_v49 = vadd.f32 %v592_v48, %v1945_v44  ;;  %v1950_v52 = vpop.f32.mrb[1].mxu1 }
 0x230   : > { %v595_v41 = vadd.f32 %v1950_v52, %v1956_v61 }
 0x231   : > { %1177 = vtanh.f32 %v593_v49  ;;  %v997_v53 = vmul.f32 -1.442695, %v593_v49 }
 0x233   : > { %1179 = vpow2.f32 %v997_v53 }
 0x239   : > { %v1176_v50 = vpop.eup %1175 }
 0x23a   : > { %996 = vmatmul.mubr.msk.f32.gmra.mrb[2].mxu1 %vm420_vm1, %v1176_v50 }
 0x23b   : > { %v1178_v51 = vpop.eup %1177 }
 0x23c   : > { %611 = vrot.lane.b32.xlu0 %v1178_v51, %s1604_s23 }
 0x23d   : > { %v1180_v54 = vpop.eup %1179 }
 0x23e   : > { %v606_v55 = vadd.f32 1.0, %v1180_v54 }
 0x240   : > { %1181 = vrcp.f32 %v606_v55 }
 0x24a   : > { %v1182_v56 = vpop.eup %1181 }
 0x2ae   : > { %v612_v57 = vpop.permute.xlu0 %611 }
 0x2af   : > { %v1952_v58 = vmul.f32 %v1182_v56, %v612_v57 }
 0x2b1   : > { %1183 = vtanh.f32 %v1952_v58 }
 0x2bb   : > { %v1184_v59 = vpop.eup %1183 }
 0x2bc   : > { %617 = vrot.lane.b32.xlu1 %v1184_v59, %s1605_s24 }
 0x30d   : > { %v598_v62 = vpop.f32.mrb[2].mxu1 }
 0x30e   : > { %v600_v63 = vpop.f32.mrb[3].mxu1  ;;  %v599_v40 = vadd.f32 %v598_v62, %v1945_v44 }
 0x30f   : > { %v601_v0 = vadd.f32 %v600_v63, %v1956_v61 }
 0x311   : > { %1185 = vtanh.f32 %v601_v0  ;;  %v998_v4 = vmul.f32 -1.442695, %v601_v0 }
 0x313   : > { %1187 = vpow2.f32 %v998_v4 }
 0x31b   : > { %v1186_v1 = vpop.eup %1185 }
 0x31c   : > { %629 = vrot.lane.b32.xlu0 %v1186_v1, %s1604_s23 }
 0x31d   : > { %v1188_v5 = vpop.eup %1187 }
 0x31e   : > { %v624_v6 = vadd.f32 1.0, %v1188_v5 }
 0x320   : > { %1189 = vrcp.f32 %v624_v6 }
 0x32a   : > { %v1190_v7 = vpop.eup %1189 }
 0x32e   : > { %v618_v2 = vpop.permute.xlu1 %617 }
 0x32f   : > { %v1960_v3 = vmul.f32 %v1182_v56, %v618_v2 }
 0x331   : > { %640 = vrot.lane.b32.xlu0 %v1960_v3, %s1606_s19 }
 0x38e   : > { %v630_v8 = vpop.permute.xlu0 %629 }
 0x38f   : > { %v632_v9 = vmul.f32 %v1190_v7, %v630_v8 }
 0x391   : > { %1191 = vtanh.f32 %v632_v9 }
 0x39b   : > { %v1192_v33 = vpop.eup %1191 }
 0x39c   : > { %635 = vrot.lane.b32.xlu1 %v1192_v33, %s1605_s24 }
 0x3a3   : > { %v641_v37 = vpop.permute.xlu0 %640 }
 0x40e   : > { %v636_v35 = vpop.permute.xlu1 %635 }
 0x40f   : > { %v638_v36 = vmul.f32 %v1190_v7, %v636_v35 }
 0x411   : > { %644 = vrot.lane.b32.xlu1 %v638_v36, %s1604_s23 }
 0x483   : > { %v645_v38 = vpop.permute.xlu1 %644 }
 0x484   : > { %v648_v39 = vsel %vm647_vm2, %v641_v37, %v645_v38 }
 0x485   : > { %999 = vmatmul.mubr.msk.f32.vlgmr.msra.gmra.mrb[2].mxu0 %vm420_vm1, %v648_v39 }
 0x558   : > { %v734_v42 = vpop.f32.mrb[2].mxu0 }
 0x559   : > { %v739_v43 = vadd.f32 %v734_v42, %v599_v40  ;;  %v736_v45 = vpop.f32.mrb[3].mxu0 }
 0x55a   : > { %v768_v46 = vadd.f32 %v736_v45, %v595_v41 }
 0x55b   : > { %1193 = vtanh.f32 %v739_v43  ;;  %v1000_v44 = vmul.f32 -1.442695, %v739_v43 }
 0x55c   : > { %1195 = vtanh.f32 %v768_v46  ;;  %v1001_v49 = vmul.f32 -1.442695, %v768_v46 }
 0x55d   : > { %1197 = vpow2.f32 %v1000_v44 }
 0x55e   : > { %1199 = vpow2.f32 %v1001_v49 }
 0x565   : > { %v1194_v47 = vpop.eup %1193 }
 0x566   : > { %v1196_v48 = vpop.eup %1195  ;;  %753 = vrot.lane.b32.xlu0 %v1194_v47, %s1604_s23 }
 0x567   : > { %782 = vrot.lane.b32.xlu1 %v1196_v48, %s1604_s23  ;;  %v1198_v50 = vpop.eup %1197 }
 0x568   : > { %v1200_v51 = vpop.eup %1199  ;;  %v743_v52 = vadd.f32 1.0, %v1198_v50 }
 0x569   : > { %v772_v53 = vadd.f32 1.0, %v1200_v51 }
 0x56a   : > { %748 = vrot.lane.b32.xlu0 %v1952_v58, %s1606_s19  ;;  %1201 = vrcp.f32 %v743_v52 }
 0x56b   : > { %777 = vrot.lane.b32.xlu1 %v632_v9, %s1606_s19  ;;  %1203 = vrcp.f32 %v772_v53 }
 0x574   : > { %v1202_v54 = vpop.eup %1201 }
 0x575   : > { %v1204_v56 = vpop.eup %1203 }
 0x5d8   : > { %v754_v55 = vpop.permute.xlu0 %753 }
 0x5d9   : > { %v756_v57 = vmul.f32 %v1202_v54, %v754_v55  ;;  %v783_v59 = vpop.permute.xlu1 %782 }
 0x5da   : > { %v785_v60 = vmul.f32 %v1204_v56, %v783_v59 }
 0x5db   : > { %758 = vrot.lane.b32.xlu0 %v756_v57, %s1606_s19 }
 0x5dc   : > { %787 = vrot.lane.b32.xlu1 %v785_v60, %s1606_s19  ;;  %v749_v58 = vpop.permute.xlu0 %748 }
 0x5dd   : > { %v778_v61 = vpop.permute.xlu1 %777  ;;  %v751_v62 = vmul.f32 %v1202_v54, %v749_v58 }
 0x5de   : > { %v780_v63 = vmul.f32 %v1204_v56, %v778_v61 }
 0x64d   : > { %v759_v0 = vpop.permute.xlu0 %758 }
 0x64e   : > { %v761_v1 = vadd.f32 %v759_v0, %v751_v62  ;;  %v788_v2 = vpop.permute.xlu1 %787 }
 0x64f   : > { %v790_v4 = vadd.f32 %v788_v2, %v780_v63 }
 0x650   : > { %1205 = vtanh.f32 %v761_v1 }
 0x651   : > { %1207 = vtanh.f32 %v790_v4 }
 0x65a   : > { %v1206_v5 = vpop.eup %1205 }
 0x65b   : > { %v1208_v6 = vpop.eup %1207  ;;  %764 = vrot.lane.b32.xlu0 %v1206_v5, %s1604_s23 }
 0x65c   : > { %793 = vrot.lane.b32.xlu1 %v1208_v6, %s1604_s23 }
 0x6cd   : > { %v765_v7 = vpop.permute.xlu0 %764 }
 0x6ce   : > { %v767_v8 = vmul.f32 %v1202_v54, %v765_v7  ;;  %v794_v9 = vpop.permute.xlu1 %793 }
 0x6cf   : > { %v796_v10 = vmul.f32 %v1204_v56, %v794_v9 }
 0x6d0   : > { %v797_v11 = vadd.f32 %v767_v8, %v1960_v3 }
 0x6d1   : > { %v799_v12 = vadd.f32 %v796_v10, %v638_v36 }
 0x6d2   : > { %v798_v13 = vmul.f32 0.5, %v797_v11 }
 0x6d3   : > { %v800_v14 = vmul.f32 0.5, %v799_v12 }
 0x6d4   : > { %802 = vrot.lane.b32.xlu0 %v798_v13, %s1606_s19 }
 0x6d5   : > { %806 = vrot.lane.b32.xlu1 %v800_v14, %s1604_s23 }
 0x746   : > { %v803_v15 = vpop.permute.xlu0 %802 }
 0x747   : > { %v807_v16 = vpop.permute.xlu1 %806 }
 0x748   : > { %v809_v3 = vsel %vm647_vm2, %v803_v15, %v807_v16 }
 0x749   : > { %810 = vst.msk [vmem:[%s252_s17] sm:$0xff] %vm420_vm1, %v809_v3 }
 0x74a   : > { %1508 = shalt.err (!%p1505_p7)
}
 0x74b   : > { %s1509_s22 = scalar_lea.hbm %s1989_s26, 128  ;;  %s1513_s17 = scalar_lea.hbm %s2044_s7, 256 }
 0x74c   : > { %p1510_p10 = scmp.ne.s32.totalorder %s1989_s26, %s1509_s22  ;;  %p1514_p8 = scmp.lt.u32.totalorder %s1989_s26, %s2044_s7 }
 0x74d   : > { %p1515_p3 = scmp.lt.u32.totalorder %s1513_s17, %s1509_s22  ;;  %p1517_p12 = scmp.lt.u32.totalorder %s1509_s22, %s1989_s26 }
 0x74e   : > { %p1511_p11 = pnand %p1510_p10, %p2076_p13 }
 0x74f   : > { %p1516_p9 = por %p1515_p3, %p1514_p8 }
 0x750   : > { %p1512_p0 = pneg %p1511_p11 }
 0x751   : > { %p1518_p1 = por %p1517_p12, %p1516_p9 }
 0x753   : > { %p1519_p2 = pnand %p1518_p1, %p1512_p0 }
 0x755   : > { %1522 = shalt.err (!%p1519_p2)
}
 0x756   : > { %1098 = dma.vmem_to_hbm [thread:$0]  (%p2076_p13), %s1991_s29, 128, %s1989_s26, %s812_s27  }
 0x757 PF: > { %p1120_p4 = scmp.ge.s32.totalorder %s1583_s14, 2  ;;  %s837_s25 = sand.u32 1, %s1571_s11  }
 0x758   : > { %p2077_p5 = scmp.ne.s32.totalorder %s2061_s21, 0  ;;  %s838_s18 = scalar_lea.sflag [#allocation8], %s837_s25 }
 0x75a   : > { %p1111_p6 = pnand %p1120_p4, %p2077_p5 }
 0x75c   : > { %1566 = dma.done.wait (!%p1111_p6), %s838_s18, 128  }
 0x75d   : > { %1568 = vsyncadd (!%p1111_p6), %s838_s18, 4294967168  ;;  %s2078_s14 = sld [smem:[#allocation44_spill]]  ;;  %s2079_s23 = sld [smem:[#allocation43_spill]] }
 0x75e   : > { %s2080_s13 = sld [smem:[#allocation45_spill]]  ;;  %s2081_s11 = smov %s1575_s12 }
 0x763   : > { %p23_p7 = scmp.ge.s32.totalorder %s2078_s14, 4   ;;  %s2082_s12 = smov %s2079_s23 }
 0x765   :  { %25 = sbr.rel (!%p23_p7) target bundleno = 18 (0x12), region = 146 }
 0x76c   :  { %843 = vsyncpa [#allocation7], 1 }
 0x76d   :  { %845 = vsyncpa [#allocation7 + $0x1], 1 }
 0x76e   :  { %846 = vsyncpa [#allocation10], 1 }
 0x76f   :  { %847 = vsyncpa [#allocation8], 1 }
 0x770   :  { %849 = vsyncpa [#allocation8 + $0x1], 1 }
 0x771   :  { %850 = vsyncmov [#allocation3] }
 0x774   :  { %s851_s20 = vpop.sfrf %850 }
 0x775   :  { %p1006_p13 = scmp.ne.s32.totalorder %s851_s20, 0 }
 0x777   :  { %855 = shalt.err (%p1006_p13)  }
 0x778   :  { %857 = vsyncmov [#allocation3 + $0x1] }
 0x77b   :  { %s858_s21 = vpop.sfrf %857 }
 0x77c   :  { %p1007_p10 = scmp.ne.s32.totalorder %s858_s21, 0 }
 0x77e   :  { %862 = shalt.err (%p1007_p10)  }
 0x77f   :  { %864 = vsyncmov [#allocation3 + $0x2] }
 0x782   :  { %s865_s24 = vpop.sfrf %864 }
 0x783   :  { %p1008_p11 = scmp.ne.s32.totalorder %s865_s24, 0 }
 0x785   :  { %869 = shalt.err (%p1008_p11)  }
 0x786   :  { %871 = vsyncmov [#allocation3 + $0x3] }
 0x789   :  { %s872_s14 = vpop.sfrf %871 }
 0x78a   :  { %p1009_p0 = scmp.ne.s32.totalorder %s872_s14, 0 }
 0x78c   :  { %876 = shalt.err (%p1009_p0)  }
 0x78d   :  { %878 = vsyncmov [#allocation3 + $0x4] }
 0x790   :  { %s879_s1 = vpop.sfrf %878 }
 0x791   :  { %p1010_p8 = scmp.ne.s32.totalorder %s879_s1, 0 }
 0x793   :  { %883 = shalt.err (%p1010_p8)  }
 0x794   :  { %885 = vsyncmov [#allocation3 + $0x5] }
 0x797   :  { %s886_s3 = vpop.sfrf %885 }
 0x798   :  { %p1011_p3 = scmp.ne.s32.totalorder %s886_s3, 0 }
 0x79a   :  { %890 = shalt.err (%p1011_p3)  }
 0x79b   :  { %892 = vsyncmov [#allocation3 + $0x6] }
 0x79e   :  { %s893_s6 = vpop.sfrf %892 }
 0x79f   :  { %p1012_p9 = scmp.ne.s32.totalorder %s893_s6, 0 }
 0x7a1   :  { %897 = shalt.err (%p1012_p9)  }
 0x7a2   :  { %899 = vsyncmov [#allocation3 + $0x7] }
 0x7a5   :  { %s900_s7 = vpop.sfrf %899 }
 0x7a6   :  { %p1013_p12 = scmp.ne.s32.totalorder %s900_s7, 0 }
 0x7a8   :  { %904 = shalt.err (%p1013_p12)  }

</bundles_post_ra>
